<compile_context>
chip_gen: v5e
topology: v5e:2x2
jax: 0.10.0
libtpu: 0.0.40
codegen_flags: <defaults>
</compile_context>

<pallas_src>
import functools

import jax
import jax.numpy as jnp
import numpy as np
from jax.experimental import pallas as pl
from jax.experimental.pallas import tpu as pltpu


def _attentive_kernel(src_ref, foc_ref, w_ref, b_ref, wctx_ref, out_ref, *,
                      H, C, O, SB):
    R, CD = src_ref.shape          # R = batch_block * H rows in this block
    TN = R // H
    C2 = 2 * C

    # Row index within the block; rows with h==0 / h==H-1 must see zero padding
    # (this also masks the roll wrap-around at batch-element boundaries).
    row = jax.lax.broadcasted_iota(jnp.int32, (R, 1), 0)
    is_first = (row % H) == 0
    is_last = (row % H) == (H - 1)

    def segments(x):
        # H-shifts via XLU roll + one-row mask (no pad+slice relayouts).
        x_prev = jnp.where(is_first, 0.0, pltpu.roll(x, shift=1, axis=0))
        x_next = jnp.where(is_last, 0.0, pltpu.roll(x, shift=R - 1, axis=0))
        return [x_prev, x, x_next, x * x]

    # Both streams and all four K-segments stacked along the contraction axis:
    # a single deep (K = 8*CD) matmul whose every output lane is useful.
    x_cat = jnp.concatenate(segments(src_ref[...]) + segments(foc_ref[...]),
                            axis=1)                                  # (R, 8*CD)
    h = jnp.dot(x_cat, w_ref[...], preferred_element_type=jnp.float32) + b_ref[...]

    def gated(base):
        # [base, base+4): tri conv, tri gate, uni conv, uni gate (one slice,
        # one leaky_relu pass, one sigmoid pass); [base+4, base+4+C): sum sq.
        scal = h[:, base:base + 4]
        o = jax.nn.leaky_relu(scal, negative_slope=0.01)
        g = jax.nn.sigmoid(scal)
        norm = jnp.sqrt(h[:, base + 4:base + 4 + C])                 # (R, C)
        uni = g[:, 3:4] * norm + (1.0 - g[:, 3:4]) * o[:, 2:3]
        tri = g[:, 1:2] * norm + (1.0 - g[:, 1:2]) * o[:, 0:1]
        # torch.cat([*_uni, *_tri], dim=1): uni channels first.
        return jnp.concatenate([uni, tri], axis=1)                   # (R, 2C)

    s_cat = gated(O)       # source extras live in lanes [O, O+4+C)
    f_cat = gated(SB)      # focus extras live in lanes [SB, SB+4+C)

    # ---- dot-energy attention, lane-dense trailing axis ----------------------
    # e[b, j, i*2C + c] = s[b, i, c] * f[b, j, c]; softmax + weighted sum over
    # j (the sublane axis); the lane axis carries Hi*2C so vregs stay full.
    # Fold/unfold uses static slices + concats only (no general reshapes).
    # TODO(synk): for very large H, switch these unrolled folds to a reshape /
    #             flash-tiled loop to bound compile-time.
    s3 = s_cat.reshape(TN, H, C2)                 # leading split only (cheap)
    f3 = f_cat.reshape(TN, H, C2)
    s_flat = jnp.concatenate([s3[:, i:i + 1, :] for i in range(H)],
                             axis=2)                                 # (TN, 1, Hi*2C)
    f_tile = jnp.concatenate([f3] * H, axis=2)                       # (TN, Hj, Hi*2C)
    e = s_flat * f_tile                                              # (TN, Hj, Hi*2C)
    m = jnp.max(e, axis=1, keepdims=True)
    p = jnp.exp(e - m)
    den = jnp.sum(p, axis=1)                                         # (TN, Hi*2C)
    num = jnp.sum(p * f_tile, axis=1)                                # (TN, Hi*2C)
    inv = pl.reciprocal(den, approx=True)          # EUP slot (nearly free)
    inv = inv * (2.0 - den * inv)                  # one Newton step: << 2e-4 err
    ctx_f = num * inv                                                # (TN, Hi*2C)
    ctx3 = jnp.concatenate(
        [ctx_f[:, i * C2:(i + 1) * C2][:, None, :] for i in range(H)], axis=1)
    context = ctx3.reshape(R, C2)                 # leading merge only (cheap)

    # Final conv output (+ folded context_conv bias) already sits in the first
    # O lanes of h; add the context_conv matmul and store the full lane-dense
    # slab unmasked (extra lanes hold junk and are sliced off host-side).
    out_ref[...] = h + jnp.dot(context, wctx_ref[...],
                               preferred_element_type=jnp.float32)


def _pack_params(params, C, D, O, O_pad, SB):
    """Pack all convs of both streams into one (8*CD, O_pad) fused weight."""
    CD = C * D
    f32 = lambda k: jnp.asarray(params[k], jnp.float32)

    # Block-diagonal 0/1 selector so (x*x) @ sel == per-channel sum of squares.
    sel = jnp.zeros((CD, C), jnp.float32)
    sel = sel.at[jnp.arange(CD), jnp.arange(CD) // D].set(1.0)

    # Segments: [s_prev, s_cur, s_next, s_sq, f_prev, f_cur, f_next, f_sq].
    w = jnp.zeros((8, CD, O_pad), jnp.float32)
    w = w.at[0:3, :, 0:O].set(f32("Wconv"))                      # final conv (no bias)
    w = w.at[0:3, :, O + 0].set(f32("Wtri_s")[:, :, 0])          # src tri conv
    w = w.at[0:3, :, O + 1].set(f32("Wtri_s")[:, :, 1])          # src tri gate
    w = w.at[1, :, O + 2].set(f32("Wuni_s")[:, 0])               # src uni conv
    w = w.at[1, :, O + 3].set(f32("Wuni_s")[:, 1])               # src uni gate
    w = w.at[3, :, O + 4:O + 4 + C].set(sel)                     # src sum of squares
    w = w.at[4:7, :, SB + 0].set(f32("Wtri_f")[:, :, 0])         # foc tri conv
    w = w.at[4:7, :, SB + 1].set(f32("Wtri_f")[:, :, 1])         # foc tri gate
    w = w.at[5, :, SB + 2].set(f32("Wuni_f")[:, 0])              # foc uni conv
    w = w.at[5, :, SB + 3].set(f32("Wuni_f")[:, 1])              # foc uni gate
    w = w.at[7, :, SB + 4:SB + 4 + C].set(sel)                   # foc sum of squares
    w_big = w.reshape(8 * CD, O_pad)

    b = jnp.zeros((1, O_pad), jnp.float32)
    b = b.at[0, 0:O].set(f32("bctx")[0])                         # fold context_conv bias
    b = b.at[0, O + 0].set(params["btri_s"][0, 0])
    b = b.at[0, O + 1].set(params["btri_s"][0, 1])
    b = b.at[0, O + 2].set(params["buni_s"][0, 0])
    b = b.at[0, O + 3].set(params["buni_s"][0, 1])
    b = b.at[0, SB + 0].set(params["btri_f"][0, 0])
    b = b.at[0, SB + 1].set(params["btri_f"][0, 1])
    b = b.at[0, SB + 2].set(params["buni_f"][0, 0])
    b = b.at[0, SB + 3].set(params["buni_f"][0, 1])

    # context_conv weight, zero-padded to the lane-dense slab (bias folded above).
    wctx = jnp.zeros((2 * C, O_pad), jnp.float32)
    wctx = wctx.at[:, 0:O].set(f32("Wctx"))
    return w_big, b, wctx


def attentive_light_conv2d(source_nchw, focus_nchw, params, *, batch_block=32):
    """source/focus: (N, C, H, D) float32.  Returns (N, O, H, 1) like PyTorch."""
    N, C, H, D = source_nchw.shape
    CD = C * D
    O = params["Wconv"].shape[-1]
    # One lane-dense slab carries the final-conv columns AND both streams'
    # conv/gate scalars + sum-of-squares columns (== 128 when O+8+2C <= 128).
    O_pad = ((O + 8 + 2 * C + 127) // 128) * 128
    SB = O + 4 + C

    # Batch elements per grid step: keep >= 2 grid steps whenever N >= 2 so
    # dimension_semantics=('parallel',) can shard across v7x's two TensorCores,
    # keep block rows sublane-aligned, otherwise take as much as batch_block
    # allows (large slabs amortize the ~0.35us/step pipeline overhead on v5e).
    tn = min(batch_block, N)
    if N >= 2:
        tn = max(1, min(tn, N // 2))
    while tn < N and (tn * H) % 8 != 0:
        tn += 1
    n_blocks = -(-N // tn)
    n_pad = n_blocks * tn
    R = tn * H

    def to_rows(x):
        # (N, C, H, D) -> (N, H, C*D) -> pad N -> (N_pad*H, C*D); wrapper-side
        # layout plumbing so the kernel never reshapes across tile boundaries.
        x = jnp.transpose(x, (0, 2, 1, 3)).reshape(N, H, CD).astype(jnp.float32)
        if n_pad != N:
            x = jnp.pad(x, ((0, n_pad - N), (0, 0), (0, 0)))
        return x.reshape(n_pad * H, CD)

    src = to_rows(source_nchw)
    foc = to_rows(focus_nchw)
    w_big, b_big, wctx = _pack_params(params, C, D, O, O_pad, SB)

    kernel = functools.partial(_attentive_kernel, H=H, C=C, O=O, SB=SB)

    def const_spec(shape):
        # Grid-invariant weights; their double buffer is only a few hundred KiB
        # so we skip single-buffering (pl.Buffered(1)) for API portability.
        return pl.BlockSpec(shape, lambda n, _r=len(shape): (0,) * _r)

    # Rough per-step VMEM live set; raise the scoped limit only when the
    # defaults (16 MiB v5e / 32 MiB v6e,v7x) would be tight, capped below the
    # v7x 64 MiB physical VMEM.
    est = 4 * (4 * R * CD + 4 * R * O_pad + 8 * R * CD
               + 4 * tn * H * H * 2 * C
               + 2 * (8 * CD * O_pad + O_pad + 2 * C * O_pad))
    cparams = dict(dimension_semantics=("parallel",))
    if est > 12 * 1024 * 1024:
        cparams["vmem_limit_bytes"] = int(min(max(32 * 1024 * 1024, 2 * est),
                                              56 * 1024 * 1024))

    out = pl.pallas_call(
        kernel,
        out_shape=jax.ShapeDtypeStruct((n_pad * H, O_pad), jnp.float32),
        grid=(n_blocks,),
        in_specs=[
            pl.BlockSpec((R, CD), lambda n: (n, 0)),
            pl.BlockSpec((R, CD), lambda n: (n, 0)),
            const_spec(w_big.shape),
            const_spec(b_big.shape),
            const_spec(wctx.shape),
        ],
        out_specs=pl.BlockSpec((R, O_pad), lambda n: (n, 0)),
        compiler_params=pltpu.CompilerParams(**cparams),
    )(src, foc, w_big, b_big, wctx)

    # Strip padding, then (N, H, O) -> (N, O, H, 1) to match PyTorch.
    out = out[:N * H, :O].reshape(N, H, O)
    return jnp.transpose(out, (0, 2, 1))[..., None]


def reference(src_nchw, foc_nchw, p):
    """Pure-JAX reference mirroring the PyTorch forward pass."""
    N, C, H, D = src_nchw.shape
    CD = C * D

    def process(x_nchw, wtri, btri, wuni, buni):
        x3 = jnp.transpose(x_nchw, (0, 2, 1, 3))           # (N, H, C, D)
        x2 = x3.reshape(N, H, CD)
        xp = jnp.pad(x2, ((0, 0), (1, 0), (0, 0)))[:, :H]
        xn = jnp.pad(x2, ((0, 0), (0, 1), (0, 0)))[:, 1:]
        tri = xp @ wtri[0] + x2 @ wtri[1] + xn @ wtri[2] + btri   # (N, H, 2)
        uni = x2 @ wuni + buni                                    # (N, H, 2)
        norm = jnp.sqrt(jnp.sum(x3 * x3, axis=3))                 # (N, H, C)

        def gconv(cg):
            o = jax.nn.leaky_relu(cg[..., 0:1], negative_slope=0.01)
            g = jax.nn.sigmoid(cg[..., 1:2])
            return g * norm + (1 - g) * o

        return gconv(uni), gconv(tri), xp, x2, xn

    s_uni, s_tri, sp, s2, sn = process(src_nchw, p["Wtri_s"], p["btri_s"],
                                       p["Wuni_s"], p["buni_s"])
    f_uni, f_tri, _, _, _ = process(foc_nchw, p["Wtri_f"], p["btri_f"],
                                    p["Wuni_f"], p["buni_f"])
    s_cat = jnp.concatenate([s_uni, s_tri], axis=2)         # (N, H, 2C)
    f_cat = jnp.concatenate([f_uni, f_tri], axis=2)
    e = s_cat[:, :, None, :] * f_cat[:, None, :, :]         # (N, Hi, Hj, 2C)
    pmat = jax.nn.softmax(e, axis=2)
    context = jnp.einsum("nijc,njc->nic", pmat, f_cat)      # (N, H, 2C)
    out1 = sp @ p["Wconv"][0] + s2 @ p["Wconv"][1] + sn @ p["Wconv"][2]
    out2 = context @ p["Wctx"] + p["bctx"]
    out = out1 + out2                                       # (N, H, O)
    return jnp.transpose(out, (0, 2, 1))[..., None]


if __name__ == "__main__":
    # Small shapes: batch=2, in_channels=4, H (sequence)=16, W=kernel_height=16,
    # out_channels=4, stride=1, energy_func='dot'.
    N, C, H, D, O = 2, 4, 16, 16, 4
    CD = C * D

    key = jax.random.PRNGKey(0)
    keys = jax.random.split(key, 16)

    def rnd(k, shape, scale=0.2):
        return (scale * jax.random.normal(k, shape)).astype(jnp.float32)

    params = {
        "Wtri_s": rnd(keys[0], (3, CD, 2)), "btri_s": rnd(keys[1], (1, 2)),
        "Wuni_s": rnd(keys[2], (CD, 2)),    "buni_s": rnd(keys[3], (1, 2)),
        "Wtri_f": rnd(keys[4], (3, CD, 2)), "btri_f": rnd(keys[5], (1, 2)),
        "Wuni_f": rnd(keys[6], (CD, 2)),    "buni_f": rnd(keys[7], (1, 2)),
        "Wconv":  rnd(keys[8], (3, CD, O)),
        "Wctx":   rnd(keys[9], (2 * C, O)), "bctx":  rnd(keys[10], (1, O)),
    }
    source = rnd(keys[11], (N, C, H, D), scale=1.0)
    focus = rnd(keys[12], (N, C, H, D), scale=1.0)

    out = attentive_light_conv2d(source, focus, params)
    out = jax.block_until_ready(out)
    assert out.shape == (N, O, H, 1), out.shape

    ref = reference(source, focus, params)
    np.testing.assert_allclose(np.asarray(out), np.asarray(ref),
                               rtol=2e-4, atol=2e-4)
    print("KERNEL_OK")
</pallas_src>

<mosaic_0001>
module attributes {stable_mosaic.version = 11 : i64} {
  func.func @_attentive_kernel(%arg0: i32, %arg1: memref<16x64xf32, #tpu.memory_space<vmem>>, %arg2: memref<16x64xf32, #tpu.memory_space<vmem>>, %arg3: memref<512x128xf32, #tpu.memory_space<vmem>>, %arg4: memref<1x128xf32, #tpu.memory_space<vmem>>, %arg5: memref<8x128xf32, #tpu.memory_space<vmem>>, %arg6: memref<16x128xf32, #tpu.memory_space<vmem>>) attributes {dimension_semantics = [#tpu.dimension_semantics<parallel>], iteration_bounds = array<i64: 2>, scalar_prefetch = 0 : i64, scratch_operands = 0 : i64, tpu.core_type = #tpu.core_type<tc>, window_params = [{transform_indices = @transform_0, window_bounds = array<i64: 16, 64>}, {transform_indices = @transform_1, window_bounds = array<i64: 16, 64>}, {pipeline_mode = #tpu.pipeline_mode<synchronous>, transform_indices = @transform_2, window_bounds = array<i64: 512, 128>}, {pipeline_mode = #tpu.pipeline_mode<synchronous>, transform_indices = @transform_3, window_bounds = array<i64: 1, 128>}, {pipeline_mode = #tpu.pipeline_mode<synchronous>, transform_indices = @transform_4, window_bounds = array<i64: 8, 128>}, {transform_indices = @transform_5, window_bounds = array<i64: 16, 128>}]} {
    %0 = tpu.iota {dimensions = array<i32: 0>} : vector<16x1xi32>
    %c16_i32 = arith.constant 16 : i32
    %c0_i32 = arith.constant 0 : i32
    %1 = arith.cmpi eq, %c16_i32, %c0_i32 : i32
    %c1_i32 = arith.constant 1 : i32
    %2 = arith.select %1, %c1_i32, %c16_i32 : i32
    %3 = vector.broadcast %2 : i32 to vector<16x1xi32>
    %4 = arith.remsi %0, %3 : vector<16x1xi32>
    %c0_i32_0 = arith.constant 0 : i32
    %5 = vector.broadcast %c0_i32_0 : i32 to vector<16x1xi32>
    %6 = arith.cmpi ne, %4, %5 : vector<16x1xi32>
    %c0_i32_1 = arith.constant 0 : i32
    %7 = vector.broadcast %c0_i32_1 : i32 to vector<16x1xi32>
    %8 = arith.cmpi slt, %4, %7 : vector<16x1xi32>
    %c0_i32_2 = arith.constant 0 : i32
    %9 = arith.cmpi slt, %2, %c0_i32_2 : i32
    %10 = vector.broadcast %9 : i1 to vector<16x1xi1>
    %11 = vector.broadcast %10 : vector<16x1xi1> to vector<16x1xi1>
    %12 = arith.xori %8, %11 : vector<16x1xi1>
    %13 = arith.andi %12, %6 : vector<16x1xi1>
    %14 = vector.broadcast %2 : i32 to vector<16x1xi32>
    %15 = arith.addi %4, %14 : vector<16x1xi32>
    %16 = arith.select %13, %15, %4 : vector<16x1xi1>, vector<16x1xi32>
    %c0_i32_3 = arith.constant 0 : i32
    %17 = vector.broadcast %c0_i32_3 : i32 to vector<16x1xi32>
    %18 = arith.cmpi eq, %16, %17 : vector<16x1xi32>
    %c16_i32_4 = arith.constant 16 : i32
    %c0_i32_5 = arith.constant 0 : i32
    %19 = arith.cmpi eq, %c16_i32_4, %c0_i32_5 : i32
    %c1_i32_6 = arith.constant 1 : i32
    %20 = arith.select %19, %c1_i32_6, %c16_i32_4 : i32
    %21 = vector.broadcast %20 : i32 to vector<16x1xi32>
    %22 = arith.remsi %0, %21 : vector<16x1xi32>
    %c0_i32_7 = arith.constant 0 : i32
    %23 = vector.broadcast %c0_i32_7 : i32 to vector<16x1xi32>
    %24 = arith.cmpi ne, %22, %23 : vector<16x1xi32>
    %c0_i32_8 = arith.constant 0 : i32
    %25 = vector.broadcast %c0_i32_8 : i32 to vector<16x1xi32>
    %26 = arith.cmpi slt, %22, %25 : vector<16x1xi32>
    %c0_i32_9 = arith.constant 0 : i32
    %27 = arith.cmpi slt, %20, %c0_i32_9 : i32
    %28 = vector.broadcast %27 : i1 to vector<16x1xi1>
    %29 = vector.broadcast %28 : vector<16x1xi1> to vector<16x1xi1>
    %30 = arith.xori %26, %29 : vector<16x1xi1>
    %31 = arith.andi %30, %24 : vector<16x1xi1>
    %32 = vector.broadcast %20 : i32 to vector<16x1xi32>
    %33 = arith.addi %22, %32 : vector<16x1xi32>
    %34 = arith.select %31, %33, %22 : vector<16x1xi1>, vector<16x1xi32>
    %c15_i32 = arith.constant 15 : i32
    %35 = vector.broadcast %c15_i32 : i32 to vector<16x1xi32>
    %36 = arith.cmpi eq, %34, %35 : vector<16x1xi32>
    %c0 = arith.constant 0 : index
    %c0_10 = arith.constant 0 : index
    %37 = vector.load %arg1[%c0, %c0_10] : memref<16x64xf32, #tpu.memory_space<vmem>>, vector<16x64xf32>
    %c1_i32_11 = arith.constant 1 : i32
    %38 = tpu.dynamic_rotate %37 by %c1_i32_11 dim 0 : vector<16x64xf32>, i32 -> vector<16x64xf32>
    %cst = arith.constant 0.000000e+00 : f32
    %39 = vector.shape_cast %18 : vector<16x1xi1> to vector<16x1xi1>
    %40 = vector.broadcast %39 : vector<16x1xi1> to vector<16x64xi1>
    %41 = vector.broadcast %cst : f32 to vector<16x64xf32>
    %42 = arith.select %40, %41, %38 : vector<16x64xi1>, vector<16x64xf32>
    %c15_i32_12 = arith.constant 15 : i32
    %43 = tpu.dynamic_rotate %37 by %c15_i32_12 dim 0 : vector<16x64xf32>, i32 -> vector<16x64xf32>
    %cst_13 = arith.constant 0.000000e+00 : f32
    %44 = vector.shape_cast %36 : vector<16x1xi1> to vector<16x1xi1>
    %45 = vector.broadcast %44 : vector<16x1xi1> to vector<16x64xi1>
    %46 = vector.broadcast %cst_13 : f32 to vector<16x64xf32>
    %47 = arith.select %45, %46, %43 : vector<16x64xi1>, vector<16x64xf32>
    %48 = arith.mulf %37, %37 : vector<16x64xf32>
    %c0_14 = arith.constant 0 : index
    %c0_15 = arith.constant 0 : index
    %49 = vector.load %arg2[%c0_14, %c0_15] : memref<16x64xf32, #tpu.memory_space<vmem>>, vector<16x64xf32>
    %c1_i32_16 = arith.constant 1 : i32
    %50 = tpu.dynamic_rotate %49 by %c1_i32_16 dim 0 : vector<16x64xf32>, i32 -> vector<16x64xf32>
    %cst_17 = arith.constant 0.000000e+00 : f32
    %51 = vector.shape_cast %18 : vector<16x1xi1> to vector<16x1xi1>
    %52 = vector.broadcast %51 : vector<16x1xi1> to vector<16x64xi1>
    %53 = vector.broadcast %cst_17 : f32 to vector<16x64xf32>
    %54 = arith.select %52, %53, %50 : vector<16x64xi1>, vector<16x64xf32>
    %c15_i32_18 = arith.constant 15 : i32
    %55 = tpu.dynamic_rotate %49 by %c15_i32_18 dim 0 : vector<16x64xf32>, i32 -> vector<16x64xf32>
    %cst_19 = arith.constant 0.000000e+00 : f32
    %56 = vector.shape_cast %36 : vector<16x1xi1> to vector<16x1xi1>
    %57 = vector.broadcast %56 : vector<16x1xi1> to vector<16x64xi1>
    %58 = vector.broadcast %cst_19 : f32 to vector<16x64xf32>
    %59 = arith.select %57, %58, %55 : vector<16x64xi1>, vector<16x64xf32>
    %60 = arith.mulf %49, %49 : vector<16x64xf32>
    %61 = tpu.concatenate %42, %37, %47, %48, %54, %49, %59, %60 in 1 : vector<16x64xf32>, vector<16x64xf32>, vector<16x64xf32>, vector<16x64xf32>, vector<16x64xf32>, vector<16x64xf32>, vector<16x64xf32>, vector<16x64xf32> -> vector<16x512xf32>
    %c0_20 = arith.constant 0 : index
    %c0_21 = arith.constant 0 : index
    %62 = vector.load %arg3[%c0_20, %c0_21] : memref<512x128xf32, #tpu.memory_space<vmem>>, vector<512x128xf32>
    %cst_22 = arith.constant dense<0.000000e+00> : vector<16x128xf32>
    %63 = tpu.matmul %61, %62, %cst_22 {dimension_numbers = #tpu.dot_dimension_numbers<[1], [0], [0], [1], [0, 0, 1, 1], [], []>} : vector<16x512xf32>, vector<512x128xf32>, vector<16x128xf32> -> vector<16x128xf32>
    %c0_23 = arith.constant 0 : index
    %c0_24 = arith.constant 0 : index
    %64 = vector.load %arg4[%c0_23, %c0_24] : memref<1x128xf32, #tpu.memory_space<vmem>>, vector<1x128xf32>
    %65 = vector.broadcast %64 : vector<1x128xf32> to vector<16x128xf32>
    %66 = arith.addf %63, %65 : vector<16x128xf32>
    %67 = vector.extract_strided_slice %66 {offsets = [0, 4], sizes = [16, 4], strides = [1, 1]} : vector<16x128xf32> to vector<16x4xf32>
    %cst_25 = arith.constant 0.00999999977 : f32
    %cst_26 = arith.constant 0.000000e+00 : f32
    %68 = vector.broadcast %cst_26 : f32 to vector<16x4xf32>
    %69 = arith.cmpf oge, %67, %68 : vector<16x4xf32>
    %70 = vector.broadcast %cst_25 : f32 to vector<16x4xf32>
    %71 = arith.mulf %70, %67 : vector<16x4xf32>
    %72 = arith.select %69, %67, %71 : vector<16x4xi1>, vector<16x4xf32>
    %73 = arith.negf %67 : vector<16x4xf32>
    %74 = math.exp %73 : vector<16x4xf32>
    %cst_27 = arith.constant 1.000000e+00 : f32
    %75 = vector.broadcast %cst_27 : f32 to vector<16x4xf32>
    %76 = arith.addf %75, %74 : vector<16x4xf32>
    %77 = arith.divf %75, %76 : vector<16x4xf32>
    %78 = vector.extract_strided_slice %66 {offsets = [0, 8], sizes = [16, 4], strides = [1, 1]} : vector<16x128xf32> to vector<16x4xf32>
    %79 = math.sqrt %78 : vector<16x4xf32>
    %80 = vector.extract_strided_slice %77 {offsets = [0, 3], sizes = [16, 1], strides = [1, 1]} : vector<16x4xf32> to vector<16x1xf32>
    %81 = vector.broadcast %80 : vector<16x1xf32> to vector<16x4xf32>
    %82 = arith.mulf %81, %79 : vector<16x4xf32>
    %83 = vector.extract_strided_slice %77 {offsets = [0, 3], sizes = [16, 1], strides = [1, 1]} : vector<16x4xf32> to vector<16x1xf32>
    %cst_28 = arith.constant 1.000000e+00 : f32
    %84 = vector.broadcast %cst_28 : f32 to vector<16x1xf32>
    %85 = arith.subf %84, %83 : vector<16x1xf32>
    %86 = vector.extract_strided_slice %72 {offsets = [0, 2], sizes = [16, 1], strides = [1, 1]} : vector<16x4xf32> to vector<16x1xf32>
    %87 = arith.mulf %85, %86 : vector<16x1xf32>
    %88 = vector.broadcast %87 : vector<16x1xf32> to vector<16x4xf32>
    %89 = arith.addf %82, %88 : vector<16x4xf32>
    %90 = vector.extract_strided_slice %77 {offsets = [0, 1], sizes = [16, 1], strides = [1, 1]} : vector<16x4xf32> to vector<16x1xf32>
    %91 = vector.broadcast %90 : vector<16x1xf32> to vector<16x4xf32>
    %92 = arith.mulf %91, %79 : vector<16x4xf32>
    %93 = vector.extract_strided_slice %77 {offsets = [0, 1], sizes = [16, 1], strides = [1, 1]} : vector<16x4xf32> to vector<16x1xf32>
    %cst_29 = arith.constant 1.000000e+00 : f32
    %94 = vector.broadcast %cst_29 : f32 to vector<16x1xf32>
    %95 = arith.subf %94, %93 : vector<16x1xf32>
    %96 = vector.extract_strided_slice %72 {offsets = [0, 0], sizes = [16, 1], strides = [1, 1]} : vector<16x4xf32> to vector<16x1xf32>
    %97 = arith.mulf %95, %96 : vector<16x1xf32>
    %98 = vector.broadcast %97 : vector<16x1xf32> to vector<16x4xf32>
    %99 = arith.addf %92, %98 : vector<16x4xf32>
    %100 = tpu.concatenate %89, %99 in 1 : vector<16x4xf32>, vector<16x4xf32> -> vector<16x8xf32>
    %101 = vector.extract_strided_slice %66 {offsets = [0, 12], sizes = [16, 4], strides = [1, 1]} : vector<16x128xf32> to vector<16x4xf32>
    %cst_30 = arith.constant 0.00999999977 : f32
    %cst_31 = arith.constant 0.000000e+00 : f32
    %102 = vector.broadcast %cst_31 : f32 to vector<16x4xf32>
    %103 = arith.cmpf oge, %101, %102 : vector<16x4xf32>
    %104 = vector.broadcast %cst_30 : f32 to vector<16x4xf32>
    %105 = arith.mulf %104, %101 : vector<16x4xf32>
    %106 = arith.select %103, %101, %105 : vector<16x4xi1>, vector<16x4xf32>
    %107 = arith.negf %101 : vector<16x4xf32>
    %108 = math.exp %107 : vector<16x4xf32>
    %cst_32 = arith.constant 1.000000e+00 : f32
    %109 = vector.broadcast %cst_32 : f32 to vector<16x4xf32>
    %110 = arith.addf %109, %108 : vector<16x4xf32>
    %111 = arith.divf %109, %110 : vector<16x4xf32>
    %112 = vector.extract_strided_slice %66 {offsets = [0, 16], sizes = [16, 4], strides = [1, 1]} : vector<16x128xf32> to vector<16x4xf32>
    %113 = math.sqrt %112 : vector<16x4xf32>
    %114 = vector.extract_strided_slice %111 {offsets = [0, 3], sizes = [16, 1], strides = [1, 1]} : vector<16x4xf32> to vector<16x1xf32>
    %115 = vector.broadcast %114 : vector<16x1xf32> to vector<16x4xf32>
    %116 = arith.mulf %115, %113 : vector<16x4xf32>
    %117 = vector.extract_strided_slice %111 {offsets = [0, 3], sizes = [16, 1], strides = [1, 1]} : vector<16x4xf32> to vector<16x1xf32>
    %cst_33 = arith.constant 1.000000e+00 : f32
    %118 = vector.broadcast %cst_33 : f32 to vector<16x1xf32>
    %119 = arith.subf %118, %117 : vector<16x1xf32>
    %120 = vector.extract_strided_slice %106 {offsets = [0, 2], sizes = [16, 1], strides = [1, 1]} : vector<16x4xf32> to vector<16x1xf32>
    %121 = arith.mulf %119, %120 : vector<16x1xf32>
    %122 = vector.broadcast %121 : vector<16x1xf32> to vector<16x4xf32>
    %123 = arith.addf %116, %122 : vector<16x4xf32>
    %124 = vector.extract_strided_slice %111 {offsets = [0, 1], sizes = [16, 1], strides = [1, 1]} : vector<16x4xf32> to vector<16x1xf32>
    %125 = vector.broadcast %124 : vector<16x1xf32> to vector<16x4xf32>
    %126 = arith.mulf %125, %113 : vector<16x4xf32>
    %127 = vector.extract_strided_slice %111 {offsets = [0, 1], sizes = [16, 1], strides = [1, 1]} : vector<16x4xf32> to vector<16x1xf32>
    %cst_34 = arith.constant 1.000000e+00 : f32
    %128 = vector.broadcast %cst_34 : f32 to vector<16x1xf32>
    %129 = arith.subf %128, %127 : vector<16x1xf32>
    %130 = vector.extract_strided_slice %106 {offsets = [0, 0], sizes = [16, 1], strides = [1, 1]} : vector<16x4xf32> to vector<16x1xf32>
    %131 = arith.mulf %129, %130 : vector<16x1xf32>
    %132 = vector.broadcast %131 : vector<16x1xf32> to vector<16x4xf32>
    %133 = arith.addf %126, %132 : vector<16x4xf32>
    %134 = tpu.concatenate %123, %133 in 1 : vector<16x4xf32>, vector<16x4xf32> -> vector<16x8xf32>
    %135 = vector.shape_cast %100 : vector<16x8xf32> to vector<1x16x8xf32>
    %136 = vector.shape_cast %134 : vector<16x8xf32> to vector<1x16x8xf32>
    %137 = vector.extract_strided_slice %135 {offsets = [0, 0, 0], sizes = [1, 1, 8], strides = [1, 1, 1]} : vector<1x16x8xf32> to vector<1x1x8xf32>
    %138 = vector.extract_strided_slice %135 {offsets = [0, 1, 0], sizes = [1, 1, 8], strides = [1, 1, 1]} : vector<1x16x8xf32> to vector<1x1x8xf32>
    %139 = vector.extract_strided_slice %135 {offsets = [0, 2, 0], sizes = [1, 1, 8], strides = [1, 1, 1]} : vector<1x16x8xf32> to vector<1x1x8xf32>
    %140 = vector.extract_strided_slice %135 {offsets = [0, 3, 0], sizes = [1, 1, 8], strides = [1, 1, 1]} : vector<1x16x8xf32> to vector<1x1x8xf32>
    %141 = vector.extract_strided_slice %135 {offsets = [0, 4, 0], sizes = [1, 1, 8], strides = [1, 1, 1]} : vector<1x16x8xf32> to vector<1x1x8xf32>
    %142 = vector.extract_strided_slice %135 {offsets = [0, 5, 0], sizes = [1, 1, 8], strides = [1, 1, 1]} : vector<1x16x8xf32> to vector<1x1x8xf32>
    %143 = vector.extract_strided_slice %135 {offsets = [0, 6, 0], sizes = [1, 1, 8], strides = [1, 1, 1]} : vector<1x16x8xf32> to vector<1x1x8xf32>
    %144 = vector.extract_strided_slice %135 {offsets = [0, 7, 0], sizes = [1, 1, 8], strides = [1, 1, 1]} : vector<1x16x8xf32> to vector<1x1x8xf32>
    %145 = vector.extract_strided_slice %135 {offsets = [0, 8, 0], sizes = [1, 1, 8], strides = [1, 1, 1]} : vector<1x16x8xf32> to vector<1x1x8xf32>
    %146 = vector.extract_strided_slice %135 {offsets = [0, 9, 0], sizes = [1, 1, 8], strides = [1, 1, 1]} : vector<1x16x8xf32> to vector<1x1x8xf32>
    %147 = vector.extract_strided_slice %135 {offsets = [0, 10, 0], sizes = [1, 1, 8], strides = [1, 1, 1]} : vector<1x16x8xf32> to vector<1x1x8xf32>
    %148 = vector.extract_strided_slice %135 {offsets = [0, 11, 0], sizes = [1, 1, 8], strides = [1, 1, 1]} : vector<1x16x8xf32> to vector<1x1x8xf32>
    %149 = vector.extract_strided_slice %135 {offsets = [0, 12, 0], sizes = [1, 1, 8], strides = [1, 1, 1]} : vector<1x16x8xf32> to vector<1x1x8xf32>
    %150 = vector.extract_strided_slice %135 {offsets = [0, 13, 0], sizes = [1, 1, 8], strides = [1, 1, 1]} : vector<1x16x8xf32> to vector<1x1x8xf32>
    %151 = vector.extract_strided_slice %135 {offsets = [0, 14, 0], sizes = [1, 1, 8], strides = [1, 1, 1]} : vector<1x16x8xf32> to vector<1x1x8xf32>
    %152 = vector.extract_strided_slice %135 {offsets = [0, 15, 0], sizes = [1, 1, 8], strides = [1, 1, 1]} : vector<1x16x8xf32> to vector<1x1x8xf32>
    %153 = tpu.concatenate %137, %138, %139, %140, %141, %142, %143, %144, %145, %146, %147, %148, %149, %150, %151, %152 in 2 : vector<1x1x8xf32>, vector<1x1x8xf32>, vector<1x1x8xf32>, vector<1x1x8xf32>, vector<1x1x8xf32>, vector<1x1x8xf32>, vector<1x1x8xf32>, vector<1x1x8xf32>, vector<1x1x8xf32>, vector<1x1x8xf32>, vector<1x1x8xf32>, vector<1x1x8xf32>, vector<1x1x8xf32>, vector<1x1x8xf32>, vector<1x1x8xf32>, vector<1x1x8xf32> -> vector<1x1x128xf32>
    %154 = tpu.concatenate %136, %136, %136, %136, %136, %136, %136, %136, %136, %136, %136, %136, %136, %136, %136, %136 in 2 : vector<1x16x8xf32>, vector<1x16x8xf32>, vector<1x16x8xf32>, vector<1x16x8xf32>, vector<1x16x8xf32>, vector<1x16x8xf32>, vector<1x16x8xf32>, vector<1x16x8xf32>, vector<1x16x8xf32>, vector<1x16x8xf32>, vector<1x16x8xf32>, vector<1x16x8xf32>, vector<1x16x8xf32>, vector<1x16x8xf32>, vector<1x16x8xf32>, vector<1x16x8xf32> -> vector<1x16x128xf32>
    %155 = vector.broadcast %153 : vector<1x1x128xf32> to vector<1x16x128xf32>
    %156 = arith.mulf %155, %154 : vector<1x16x128xf32>
    %cst_35 = arith.constant dense<0xFF800000> : vector<1x128xf32>
    %157 = vector.multi_reduction <maximumf>, %156, %cst_35 [1] : vector<1x16x128xf32> to vector<1x128xf32>
    %158 = vector.shape_cast %157 : vector<1x128xf32> to vector<1x1x128xf32>
    %159 = vector.broadcast %158 : vector<1x1x128xf32> to vector<1x16x128xf32>
    %160 = arith.subf %156, %159 : vector<1x16x128xf32>
    %161 = math.exp %160 : vector<1x16x128xf32>
    %cst_36 = arith.constant dense<0.000000e+00> : vector<1x128xf32>
    %162 = vector.multi_reduction <add>, %161, %cst_36 [1] : vector<1x16x128xf32> to vector<1x128xf32>
    %163 = arith.mulf %161, %154 : vector<1x16x128xf32>
    %cst_37 = arith.constant dense<0.000000e+00> : vector<1x128xf32>
    %164 = vector.multi_reduction <add>, %163, %cst_37 [1] : vector<1x16x128xf32> to vector<1x128xf32>
    %165 = tpu.reciprocal %162 {approx = true} : vector<1x128xf32> -> vector<1x128xf32>
    %166 = arith.mulf %162, %165 : vector<1x128xf32>
    %cst_38 = arith.constant 2.000000e+00 : f32
    %167 = vector.broadcast %cst_38 : f32 to vector<1x128xf32>
    %168 = arith.subf %167, %166 : vector<1x128xf32>
    %169 = arith.mulf %165, %168 : vector<1x128xf32>
    %170 = arith.mulf %164, %169 : vector<1x128xf32>
    %171 = vector.extract_strided_slice %170 {offsets = [0, 0], sizes = [1, 8], strides = [1, 1]} : vector<1x128xf32> to vector<1x8xf32>
    %172 = vector.shape_cast %171 : vector<1x8xf32> to vector<1x1x8xf32>
    %173 = vector.extract_strided_slice %170 {offsets = [0, 8], sizes = [1, 8], strides = [1, 1]} : vector<1x128xf32> to vector<1x8xf32>
    %174 = vector.shape_cast %173 : vector<1x8xf32> to vector<1x1x8xf32>
    %175 = vector.extract_strided_slice %170 {offsets = [0, 16], sizes = [1, 8], strides = [1, 1]} : vector<1x128xf32> to vector<1x8xf32>
    %176 = vector.shape_cast %175 : vector<1x8xf32> to vector<1x1x8xf32>
    %177 = vector.extract_strided_slice %170 {offsets = [0, 24], sizes = [1, 8], strides = [1, 1]} : vector<1x128xf32> to vector<1x8xf32>
    %178 = vector.shape_cast %177 : vector<1x8xf32> to vector<1x1x8xf32>
    %179 = vector.extract_strided_slice %170 {offsets = [0, 32], sizes = [1, 8], strides = [1, 1]} : vector<1x128xf32> to vector<1x8xf32>
    %180 = vector.shape_cast %179 : vector<1x8xf32> to vector<1x1x8xf32>
    %181 = vector.extract_strided_slice %170 {offsets = [0, 40], sizes = [1, 8], strides = [1, 1]} : vector<1x128xf32> to vector<1x8xf32>
    %182 = vector.shape_cast %181 : vector<1x8xf32> to vector<1x1x8xf32>
    %183 = vector.extract_strided_slice %170 {offsets = [0, 48], sizes = [1, 8], strides = [1, 1]} : vector<1x128xf32> to vector<1x8xf32>
    %184 = vector.shape_cast %183 : vector<1x8xf32> to vector<1x1x8xf32>
    %185 = vector.extract_strided_slice %170 {offsets = [0, 56], sizes = [1, 8], strides = [1, 1]} : vector<1x128xf32> to vector<1x8xf32>
    %186 = vector.shape_cast %185 : vector<1x8xf32> to vector<1x1x8xf32>
    %187 = vector.extract_strided_slice %170 {offsets = [0, 64], sizes = [1, 8], strides = [1, 1]} : vector<1x128xf32> to vector<1x8xf32>
    %188 = vector.shape_cast %187 : vector<1x8xf32> to vector<1x1x8xf32>
    %189 = vector.extract_strided_slice %170 {offsets = [0, 72], sizes = [1, 8], strides = [1, 1]} : vector<1x128xf32> to vector<1x8xf32>
    %190 = vector.shape_cast %189 : vector<1x8xf32> to vector<1x1x8xf32>
    %191 = vector.extract_strided_slice %170 {offsets = [0, 80], sizes = [1, 8], strides = [1, 1]} : vector<1x128xf32> to vector<1x8xf32>
    %192 = vector.shape_cast %191 : vector<1x8xf32> to vector<1x1x8xf32>
    %193 = vector.extract_strided_slice %170 {offsets = [0, 88], sizes = [1, 8], strides = [1, 1]} : vector<1x128xf32> to vector<1x8xf32>
    %194 = vector.shape_cast %193 : vector<1x8xf32> to vector<1x1x8xf32>
    %195 = vector.extract_strided_slice %170 {offsets = [0, 96], sizes = [1, 8], strides = [1, 1]} : vector<1x128xf32> to vector<1x8xf32>
    %196 = vector.shape_cast %195 : vector<1x8xf32> to vector<1x1x8xf32>
    %197 = vector.extract_strided_slice %170 {offsets = [0, 104], sizes = [1, 8], strides = [1, 1]} : vector<1x128xf32> to vector<1x8xf32>
    %198 = vector.shape_cast %197 : vector<1x8xf32> to vector<1x1x8xf32>
    %199 = vector.extract_strided_slice %170 {offsets = [0, 112], sizes = [1, 8], strides = [1, 1]} : vector<1x128xf32> to vector<1x8xf32>
    %200 = vector.shape_cast %199 : vector<1x8xf32> to vector<1x1x8xf32>
    %201 = vector.extract_strided_slice %170 {offsets = [0, 120], sizes = [1, 8], strides = [1, 1]} : vector<1x128xf32> to vector<1x8xf32>
    %202 = vector.shape_cast %201 : vector<1x8xf32> to vector<1x1x8xf32>
    %203 = tpu.concatenate %172, %174, %176, %178, %180, %182, %184, %186, %188, %190, %192, %194, %196, %198, %200, %202 in 1 : vector<1x1x8xf32>, vector<1x1x8xf32>, vector<1x1x8xf32>, vector<1x1x8xf32>, vector<1x1x8xf32>, vector<1x1x8xf32>, vector<1x1x8xf32>, vector<1x1x8xf32>, vector<1x1x8xf32>, vector<1x1x8xf32>, vector<1x1x8xf32>, vector<1x1x8xf32>, vector<1x1x8xf32>, vector<1x1x8xf32>, vector<1x1x8xf32>, vector<1x1x8xf32> -> vector<1x16x8xf32>
    %204 = vector.shape_cast %203 : vector<1x16x8xf32> to vector<16x8xf32>
    %c0_39 = arith.constant 0 : index
    %c0_40 = arith.constant 0 : index
    %205 = vector.load %arg5[%c0_39, %c0_40] : memref<8x128xf32, #tpu.memory_space<vmem>>, vector<8x128xf32>
    %cst_41 = arith.constant dense<0.000000e+00> : vector<16x128xf32>
    %206 = tpu.matmul %204, %205, %cst_41 {dimension_numbers = #tpu.dot_dimension_numbers<[1], [0], [0], [1], [0, 0, 1, 1], [], []>} : vector<16x8xf32>, vector<8x128xf32>, vector<16x128xf32> -> vector<16x128xf32>
    %207 = arith.addf %66, %206 : vector<16x128xf32>
    %c0_42 = arith.constant 0 : index
    %c0_43 = arith.constant 0 : index
    %208 = vector.load %arg6[%c0_42, %c0_43] : memref<16x128xf32, #tpu.memory_space<vmem>>, vector<16x128xf32>
    tpu.vector_store %arg6[%c0_42, %c0_43], %207 {strides = array<i32>} : memref<16x128xf32, #tpu.memory_space<vmem>>, vector<16x128xf32>,
    return
  }
  func.func @transform_0(%arg0: i32) -> (i32, i32) {
    %c0_i32 = arith.constant 0 : i32
    %c0_i32_0 = arith.constant 0 : i32
    return %arg0, %c0_i32 : i32, i32
  }
  func.func @transform_1(%arg0: i32) -> (i32, i32) {
    %c0_i32 = arith.constant 0 : i32
    %c0_i32_0 = arith.constant 0 : i32
    return %arg0, %c0_i32 : i32, i32
  }
  func.func @transform_2(%arg0: i32) -> (i32, i32) {
    %c0_i32 = arith.constant 0 : i32
    %c0_i32_0 = arith.constant 0 : i32
    %c0_i32_1 = arith.constant 0 : i32
    return %c0_i32, %c0_i32_0 : i32, i32
  }
  func.func @transform_3(%arg0: i32) -> (i32, i32) {
    %c0_i32 = arith.constant 0 : i32
    %c0_i32_0 = arith.constant 0 : i32
    %c0_i32_1 = arith.constant 0 : i32
    return %c0_i32, %c0_i32_0 : i32, i32
  }
  func.func @transform_4(%arg0: i32) -> (i32, i32) {
    %c0_i32 = arith.constant 0 : i32
    %c0_i32_0 = arith.constant 0 : i32
    %c0_i32_1 = arith.constant 0 : i32
    return %c0_i32, %c0_i32_0 : i32, i32
  }
  func.func @transform_5(%arg0: i32) -> (i32, i32) {
    %c0_i32 = arith.constant 0 : i32
    %c0_i32_0 = arith.constant 0 : i32
    return %arg0, %c0_i32 : i32, i32
  }
}

</mosaic_0001>

<bundles_post_ra>
// kernel: tpu_custom_call.1
= control target key start
LH: loop header
LB: loop body
LE: loop exit
PB: predicated region body
PF: predicated region fallthrough
CT: control target
= control target key end

     0   :  { %s2157_s0 = inlined_call_operand.hbm [shape: f32[32,64], index: 0, kind: input, shape index: {}]   ;;  %s2158_s1 = inlined_call_operand.hbm [shape: f32[32,64], index: 1, kind: input, shape index: {}]   ;;  %s2159_s2 = inlined_call_operand.hbm [shape: f32[512,128], index: 2, kind: input, shape index: {}]   ;;  %s2160_s3 = inlined_call_operand.vmem [shape: f32[1,128], index: 3, kind: input, shape index: {}]   ;;  %s2161_s4 = inlined_call_operand.hbm [shape: f32[8,128], index: 4, kind: input, shape index: {}]   ;;  %s2162_s5 = inlined_call_operand.hbm [shape: f32[32,128], index: 5, kind: output, shape index: {}]  }
   0x1   :  { %2167 = sst [smem:[#allocation17_spill]] %s2157_s0 }
   0x2   :  { %2168 = sst [smem:[#allocation18_spill]] %s2159_s2 }
   0x3   :  { %2169 = sst [smem:[#allocation19_spill]] %s2161_s4 }
   0x4   :  { %10 = vsyncpa [#allocation3], 0 }
   0x5   :  { %12 = vsyncpa [#allocation3 + $0x1], 0 }
   0x6   :  { %13 = vsyncpa [#allocation6], 0 }
   0x7   :  { %15 = vsyncpa [#allocation6 + $0x1], 0 }
   0x8   :  { %16 = vsyncpa [#allocation9], 0 }
   0x9   :  { %17 = vsyncpa [#allocation4], 0 }
   0xa   :  { %19 = vsyncpa [#allocation4 + $0x1], 0  ;;  %s1715_s18 = smov 0   ;;  %s1717_s19 = smov 0  }
   0xb   :  { %s1719_s20 = smov 0   ;;  %s1721_s21 = smov 0  }
   0xc LB: > { %s1736_s22 = sadd.s32 4294967295, %s1656_s21   ;;  %s1277_s23 = sadd.s32 4294967294, %s1656_s21   ;;  %s1656_s21 = sphi %s1721_s21, %s2186_s21   ;;  %s1652_s20 = sphi %s1719_s20, %s2185_s20   ;;  %s1648_s19 = sphi %s1717_s19, %s2184_s19   ;;  %s1644_s18 = sphi %s1715_s18, %s2183_s18  }
   0xd   : > { %p45_p0 = scmp.ne.s32.totalorder %s1648_s19, %s1644_s18  ;;  %p46_p1 = scmp.eq.s32.totalorder %s1736_s22, 0 }
   0xe   : > { %p158_p2 = scmp.eq.s32.totalorder %s1736_s22, 1  ;;  %p164_p3 = scmp.eq.s32.totalorder %s1277_s23, 1 }
   0xf   : > { %p1745_p4 = por %p46_p1, %p45_p0  ;;  %p1278_p5 = scmp.ge.s32.totalorder %s1656_s21, 1 }
  0x10   : > { %p1750_p6 = por %p164_p3, %p45_p0  ;;  %p171_p7 = scmp.lt.s32.totalorder %s1656_s21, 3 }
  0x11   : > { %s2172_s2 = sld [smem:[#allocation18_spill]]  ;;  %s1658_s30 = smov [#allocation7]  }
  0x12   : > { %p1758_p8 = pnand %p1278_p5, %p171_p7  ;;  %s184_s6 = sshll.u32 %s1658_s30, 4  ;;  %s185_s6 = int_to_ptr.vmem [resolvable:$true] %s184_s6 }
  0x13   : > { %s2174_s4 = sld [smem:[#allocation19_spill]]  ;;  %s2163_s10 = smov 128  }
  0x14   : > { %p1321_p9 = pneg %p1758_p8  ;;  %s2165_s11 = smov 8  }
  0x15   : > { %s1661_s12 = smov [#allocation8]   ;;  %s1774_s14 = sadd.s32 1, %s1656_s21  }
  0x16   : > { %p1322_p10 = pnand %p1321_p9, %p46_p1  ;;  %s202_s13 = sshll.u32 %s1661_s12, 4  ;;  %s203_s13 = int_to_ptr.vmem [resolvable:$true] %s202_s13 }
  0x17   : > { %s182_s28 = sshll.u32 %s2172_s2, 4  ;;  %s32_s15 = sadd.s32 1, %s1652_s20  ;;  %s183_s28 = int_to_ptr.hbm [resolvable:$true] %s182_s28 }
  0x18   : > { %1324 = dma.hbm_to_vmem [thread:$0]  (!%p1322_p10), %s183_s28, 8192, %s185_s6, [#allocation6], %s2163_s10, %s2163_s10, %s2165_s11  }
  0x19   : > { %s200_s9 = sshll.u32 %s2174_s4, 4  ;;  %s29_s16 = ssub.s32 %s1656_s21, %s1774_s14  ;;  %s201_s9 = int_to_ptr.hbm [resolvable:$true] %s200_s9 }
  0x1a   : > { %1327 = dma.hbm_to_vmem [thread:$0]  (!%p1322_p10), %s201_s9, 128, %s203_s13, [#allocation9]  }
  0x1b   : > { %p39_p12 = scmp.ne.s32.totalorder %s1652_s20, %s1648_s19  ;;  %p30_p13 = scmp.eq.s32.totalorder %s29_s16, 0 }
  0x1c   : > { %p40_p0 = scmp.eq.s32.totalorder %s1656_s21, 0  ;;  %p1341_p5 = scmp.lt.s32.totalorder %s1656_s21, 2 }
  0x1d   : > { %p1784_p3 = por %p158_p2, %p39_p12  ;;  %s213_s26 = sand.u32 1, %s1652_s20  }
  0x1e   : > { %s1790_s23 = scalar_select %p30_p13, %s1652_s20, %s32_s15  }
  0x1f   : > { %p41_p7 = por %p40_p0, %p39_p12  ;;  %s1793_s27 = sshll.u32 %s213_s26, 4 }
  0x20   : > { %2176 = sst [smem:[#allocation16_spill]] %s1790_s23  ;;  %s1303_s28 = sshll.u32 %s1656_s21, 4 }
  0x21   : > { %s2177_s0 = sld [smem:[#allocation17_spill]]  ;;  %s217_s8 = scalar_lea.vmem [#allocation2], %s1793_s27 }
  0x22   : > { %s225_s9 = sshll.u32 %s217_s8, 4  ;;  %p1800_p2 = pnand %p1341_p5, %p41_p7  ;;  %s226_s9 = int_to_ptr.vmem [resolvable:$true] %s225_s9 }
  0x23   : > { %s244_s10 = scalar_lea.hbm %s2158_s1, %s1303_s28  ;;  %s214_s2 = scalar_lea.sflag [#allocation3], %s213_s26 }
  0x24   : > { %s245_s11 = sshll.u32 %s244_s10, 4  ;;  %p1522_p10 = pneg %p1800_p2  ;;  %s246_s11 = int_to_ptr.hbm [resolvable:$true] %s245_s11 }
  0x27   : > { %s222_s7 = scalar_lea.hbm %s2177_s0, %s1303_s28  ;;  %s1525_s8 = scalar_lea.hbm %s2177_s0, 32 }
  0x28   : > { %s223_s12 = sshll.u32 %s222_s7, 4  ;;  %s224_s12 = int_to_ptr.hbm [resolvable:$true] %s223_s12 }
  0x29   : > { %s1518_s4 = sshra.s32 %s224_s12, 4  ;;  %s1519_s4 = int_to_ptr.hbm [resolvable:$true] %s1518_s4 }
  0x2a   : > { %s1520_s30 = scalar_lea.hbm %s1519_s4, 16  ;;  %p1526_p0 = scmp.lt.s32.totalorder %s1519_s4, %s2177_s0 }
  0x2b   : > { %p1521_p9 = scmp.ne.s32.totalorder %s1519_s4, %s1520_s30  ;;  %p1527_p5 = scmp.lt.s32.totalorder %s1525_s8, %s1520_s30 }
  0x2d   : > { %p1523_p12 = pnand %p1522_p10, %p1521_p9  ;;  %p1528_p7 = por %p1527_p5, %p1526_p0 }
  0x2f   : > { %p1524_p13 = pneg %p1523_p12 }
  0x31   : > { %p1529_p11 = pnand %p1528_p7, %p1524_p13 }
  0x33   : > { %1532 = shalt.err (!%p1529_p11)
}
  0x34   : > { %s2179_s10 = smov 8   ;;  %s2180_s26 = smov 128  }
  0x35   : > { %1331 = dma.hbm_to_vmem [thread:$0]  (!%p1800_p2), %s224_s12, 256, %s226_s9, %s214_s2, %s2180_s26, %s2180_s26, %s2179_s10  }
  0x36   : > { %s239_s28 = scalar_lea.vmem [#allocation5], %s1793_s27  ;;  %s235_s7 = sand.u32 1, %s1656_s21  }
  0x37   : > { %s247_s6 = sshll.u32 %s239_s28, 4  ;;  %s236_s15 = scalar_lea.sflag [#allocation6], %s235_s7  ;;  %s248_s6 = int_to_ptr.vmem [resolvable:$true] %s247_s6 }
  0x38   : > { %s1548_s4 = sshra.s32 %s246_s11, 4  ;;  %s1555_s0 = scalar_lea.hbm %s2158_s1, 32  ;;  %s1549_s4 = int_to_ptr.hbm [resolvable:$true] %s1548_s4 }
  0x39   : > { %s1550_s30 = scalar_lea.hbm %s1549_s4, 16  ;;  %p1556_p13 = scmp.lt.s32.totalorder %s1549_s4, %s2158_s1 }
  0x3a   : > { %p1551_p9 = scmp.ne.s32.totalorder %s1549_s4, %s1550_s30  ;;  %p1557_p0 = scmp.lt.s32.totalorder %s1555_s0, %s1550_s30 }
  0x3c   : > { %p1553_p11 = pnand %p1551_p9, %p1522_p10  ;;  %p1558_p5 = por %p1557_p0, %p1556_p13 }
  0x3e   : > { %p1554_p12 = pneg %p1553_p11 }
  0x40   : > { %p1559_p7 = pnand %p1558_p5, %p1554_p12 }
  0x42   : > { %1562 = shalt.err (!%p1559_p7)
}
  0x43   : > { %1334 = dma.hbm_to_vmem [thread:$0]  (!%p1800_p2), %s246_s11, 256, %s248_s6, %s236_s15, %s2180_s26, %s2180_s26, %s2179_s10  }
  0x44   : > { %259 = sbr.rel (%p1758_p8) target bundleno = 1251 (0x4e3), region = 40  ;;  %s1842_s27 = sand.u32 (!%p1758_p8), 1, %s1648_s19  }
  0x45   : > { %s1845_s23 = sshll.u32 (!%p1758_p8), %s1842_s27, 4  ;;  %s262_s0 = scalar_lea.sflag (!%p1758_p8), [#allocation3], %s1842_s27 }
  0x46   : > { %s265_s9 = scalar_lea.vmem (!%p1758_p8), [#allocation2], %s1845_s23 }
  0x49   : > { %1623 = dma.done.wait (%p1745_p4), %s262_s0, 256  }
  0x4a   : > { %1625 = vsyncadd (%p1745_p4), %s262_s0, 4294967040  ;;  %s271_s29 = sand.u32 1, %s1736_s22   ;;  %s275_s12 = scalar_lea.vmem [#allocation5], %s1845_s23 }
  0x4b   : > { %s272_s11 = scalar_lea.sflag [#allocation6], %s271_s29 }
  0x4c   : > { %1627 = dma.done.wait (%p1745_p4), %s272_s11, 256  }
  0x4d   : > { %1629 = vsyncadd (%p1745_p4), %s272_s11, 4294967040 }
  0x4e   : > { %1631 = dma.done.wait (%p46_p1), [#allocation6], 8192  }
  0x4f   : > { %1633 = vsyncadd (%p46_p1), [#allocation6], 4294959104 }
  0x50   : > { %1635 = dma.done.wait (%p46_p1), [#allocation9], 128  }
  0x51   : > { %1637 = vsyncadd (%p46_p1), [#allocation9], 4294967168  ;;  %v1867_v0 = vld [vmem:[%s265_s9] sm:$0xff]  ;;  %v1871_v2 = vld [vmem:[%s265_s9 + $0x8] sm:$0xff]  ;;  %s1662_s24 = smov 64   ;;  %vm426_vm2 = vcmask 523264  }
  0x52   : > { %v1869_v1 = vld [vmem:[%s275_s12] sm:$0xff]  ;;  %v1875_v4 = vld [vmem:[%s275_s12 + $0x8] sm:$0xff]  ;;  %v376_v10 = vmul.f32 %v1867_v0, %v1867_v0  ;;  %v377_v13 = vmul.f32 %v1871_v2, %v1871_v2  ;;  %s1666_s26 = smov 1   ;;  %s1668_s28 = smov 120  }
  0x53   : > { %v1404_v3 = vpack.i.bf16 %v1867_v0, %v1869_v1  ;;  %v450_v5 = vld [vmem:[#allocation7 + $0x78] sm:$0xff]  ;;  %v1414_v7 = vpack.i.bf16 %v1871_v2, %v1875_v4  ;;  %v449_v8 = vld [vmem:[#allocation7 + $0x70] sm:$0xff]  ;;  %v392_v11 = vmul.f32 %v1869_v1, %v1869_v1  ;;  %v448_v12 = vld [vmem:[#allocation7 + $0x68] sm:$0xff]  ;;  %v393_v14 = vmul.f32 %v1875_v4, %v1875_v4  ;;  %s1669_s6 = smov 116   ;;  %s1670_s7 = smov 124  }
  0x54   : > { %v482_v6 = vld [vmem:[#allocation7 + $0x178] sm:$0xff]  ;;  %503 = vmatpush.msra.mxu0 %v450_v5  ;;  %v481_v9 = vld [vmem:[#allocation7 + $0x170] sm:$0xff]  ;;  %v480_v15 = vld [vmem:[#allocation7 + $0x168] sm:$0xff]  ;;  %s1671_s15 = smov 112   ;;  %s1672_s4 = smov 16  }
  0x55   : > { %549 = vmatpush.msra.mxu2 %v482_v6  ;;  %1405 = vrot.lane.b32.xlu0 %v1404_v3, %s1662_s24  ;;  %v466_v16 = vld [vmem:[#allocation7 + $0xf8] sm:$0xff]  ;;  %v447_v17 = vld [vmem:[#allocation7 + $0x60] sm:$0xff]  ;;  %v465_v19 = vld [vmem:[#allocation7 + $0xf0] sm:$0xff]  ;;  %v1409_v22 = vpack.i.bf16 %v376_v10, %v392_v11  ;;  %v1419_v26 = vpack.i.bf16 %v377_v13, %v393_v14  ;;  %s1673_s30 = smov 8   ;;  %s1674_s8 = smov 24  }
  0x56   : > { %1415 = vrot.lane.b32.xlu1 %v1414_v7, %s1662_s24  ;;  %504 = vmatpush.msra.mxu0 %v449_v8  ;;  %v498_v18 = vld [vmem:[#allocation7 + $0x1f8] sm:$0xff]  ;;  %v479_v20 = vld [vmem:[#allocation7 + $0x160] sm:$0xff]  ;;  %v497_v21 = vld [vmem:[#allocation7 + $0x1f0] sm:$0xff]  ;;  %s1675_s16 = smov 32   ;;  %s1676_s2 = smov 40  }
  0x57   : > { %550 = vmatpush.msra.mxu2 %v481_v9  ;;  %526 = vmatpush.msra.mxu1 %v466_v16  ;;  %v446_v23 = vld [vmem:[#allocation7 + $0x58] sm:$0xff]  ;;  %v464_v24 = vld [vmem:[#allocation7 + $0xe8] sm:$0xff]  ;;  %v445_v28 = vld [vmem:[#allocation7 + $0x50] sm:$0xff]  ;;  %v321_v16 = vlaneseq  ;;  %s1677_s0 = smov 48   ;;  %s1678_s9 = smov 56  }
  0x58   : > { %505 = vmatpush.msra.mxu0 %v448_v12  ;;  %572 = vmatpush.msra.mxu3 %v498_v18  ;;  %v496_v25 = vld [vmem:[#allocation7 + $0x1e8] sm:$0xff]  ;;  %v478_v27 = vld [vmem:[#allocation7 + $0x158] sm:$0xff]  ;;  %v477_v29 = vld [vmem:[#allocation7 + $0x150] sm:$0xff]  ;;  %s1679_s29 = smov 72   ;;  %s1680_s11 = smov 80  }
  0x59   : > { %551 = vmatpush.msra.mxu2 %v480_v15  ;;  %527 = vmatpush.msra.mxu1 %v465_v19  ;;  %v463_v30 = vld [vmem:[#allocation7 + $0xe0] sm:$0xff]  ;;  %v444_v31 = vld [vmem:[#allocation7 + $0x48] sm:$0xff]  ;;  %v462_v34 = vld [vmem:[#allocation7 + $0xd8] sm:$0xff]  ;;  %v354_v19 = vrot.slane %v1867_v0, 7  ;;  %s1681_s12 = smov 88   ;;  %s1682_s13 = smov 96  }
  0x5a   : > { %506 = vmatpush.msra.mxu0 %v447_v17  ;;  %573 = vmatpush.msra.mxu3 %v497_v21  ;;  %v495_v32 = vld [vmem:[#allocation7 + $0x1e0] sm:$0xff]  ;;  %v476_v33 = vld [vmem:[#allocation7 + $0x148] sm:$0xff]  ;;  %v494_v36 = vld [vmem:[#allocation7 + $0x1d8] sm:$0xff]  ;;  %v322_v17 = vshrl.u32 %v321_v16, 7  ;;  %v380_v21 = vrot.slane %v1869_v1, 7  ;;  %s1683_s10 = smov 104  }
  0x5b   : > { %552 = vmatpush.msra.mxu2 %v479_v20  ;;  %528 = vmatpush.msra.mxu1 %v464_v24  ;;  %v443_v35 = vld [vmem:[#allocation7 + $0x40] sm:$0xff]  ;;  %v461_v38 = vld [vmem:[#allocation7 + $0xd0] sm:$0xff]  ;;  %v442_v39 = vld [vmem:[#allocation7 + $0x38] sm:$0xff]  ;;  %v355_v20 = vrot.slane %v1871_v2, 7 }
  0x5c   : > { %507 = vmatpush.msra.mxu0 %v446_v23  ;;  %574 = vmatpush.msra.mxu3 %v496_v25  ;;  %v475_v37 = vld [vmem:[#allocation7 + $0x140] sm:$0xff]  ;;  %v493_v40 = vld [vmem:[#allocation7 + $0x1d0] sm:$0xff]  ;;  %v474_v41 = vld [vmem:[#allocation7 + $0x138] sm:$0xff]  ;;  %v328_v18 = vand.u32 15, %v322_v17  ;;  %vm356_vm0 = vcmp.lt.s32.totalorder %v322_v17, 1  ;;  %vm367_vm3 = vcmp.lt.s32.totalorder %v322_v17, 7 }
  0x5d   : > { %1410 = vrot.lane.b32.xlu0 %v1409_v22, %s1662_s24  ;;  %553 = vmatpush.msra.mxu2 %v478_v27  ;;  %v460_v42 = vld [vmem:[#allocation7 + $0xc8] sm:$0xff]  ;;  %v441_v43 = vld [vmem:[#allocation7 + $0x30] sm:$0xff]  ;;  %v459_v46 = vld [vmem:[#allocation7 + $0xc0] sm:$0xff]  ;;  %v381_v22 = vrot.slane %v1875_v4, 7  ;;  %v358_v23 = vsel %vm356_vm0, %v355_v20, %v354_v19 }
  0x5e   : > { %1420 = vrot.lane.b32.xlu1 %v1419_v26, %s1662_s24  ;;  %508 = vmatpush.msra.mxu0 %v445_v28  ;;  %v492_v44 = vld [vmem:[#allocation7 + $0x1c8] sm:$0xff]  ;;  %v473_v45 = vld [vmem:[#allocation7 + $0x130] sm:$0xff]  ;;  %v491_v48 = vld [vmem:[#allocation7 + $0x1c0] sm:$0xff]  ;;  %vm348_vm1 = vcmp.eq.s32.totalorder %v328_v18, 0 }
  0x5f   : > { %554 = vmatpush.msra.mxu2 %v477_v29  ;;  %529 = vmatpush.msra.mxu1 %v463_v30  ;;  %v440_v47 = vld [vmem:[#allocation7 + $0x28] sm:$0xff]  ;;  %v458_v50 = vld [vmem:[#allocation7 + $0xb8] sm:$0xff]  ;;  %v439_v51 = vld [vmem:[#allocation7 + $0x20] sm:$0xff]  ;;  %v383_v24 = vsel %vm356_vm0, %v381_v22, %v380_v21  ;;  %v363_v26 = vsel %vm348_vm1, 0.0, %v358_v23 }
  0x60   : > { %509 = vmatpush.msra.mxu0 %v444_v31  ;;  %575 = vmatpush.msra.mxu3 %v495_v32  ;;  %v472_v49 = vld [vmem:[#allocation7 + $0x128] sm:$0xff]  ;;  %v490_v52 = vld [vmem:[#allocation7 + $0x1b8] sm:$0xff]  ;;  %v471_v53 = vld [vmem:[#allocation7 + $0x120] sm:$0xff]  ;;  %v384_v27 = vsel %vm348_vm1, 0.0, %v383_v24 }
  0x61   : > { %555 = vmatpush.msra.mxu2 %v476_v33  ;;  %530 = vmatpush.msra.mxu1 %v462_v34  ;;  %v457_v54 = vld [vmem:[#allocation7 + $0xb0] sm:$0xff]  ;;  %v438_v55 = vld [vmem:[#allocation7 + $0x18] sm:$0xff]  ;;  %v436_v60 = vld [vmem:[#allocation7 + $0x8] sm:$0xff]  ;;  %v323_v33 = vadd.s32 8, %v322_v17  ;;  %v365_v34 = vrot.slane %v1867_v0, 1 }
  0x62   : > { %510 = vmatpush.msra.mxu0 %v443_v35  ;;  %576 = vmatpush.msra.mxu3 %v494_v36  ;;  %v489_v56 = vld [vmem:[#allocation7 + $0x1b0] sm:$0xff]  ;;  %v470_v57 = vld [vmem:[#allocation7 + $0x118] sm:$0xff]  ;;  %v456_v61 = vld [vmem:[#allocation7 + $0xa8] sm:$0xff]  ;;  %v366_v35 = vrot.slane %v1871_v2, 1  ;;  %v386_v36 = vrot.slane %v1869_v1, 1 }
  0x63   : > { %556 = vmatpush.msra.mxu2 %v475_v37  ;;  %531 = vmatpush.msra.mxu1 %v461_v38  ;;  %v437_v58 = vld [vmem:[#allocation7 + $0x10] sm:$0xff]  ;;  %v468_v62 = vld [vmem:[#allocation7 + $0x108] sm:$0xff]  ;;  %v435_v3 = vld [vmem:[#allocation7] sm:$0xff]  ;;  %v387_v37 = vrot.slane %v1875_v4, 1 }
  0x64   : > { %511 = vmatpush.msra.mxu0 %v442_v39  ;;  %577 = vmatpush.msra.mxu3 %v493_v40  ;;  %v469_v59 = vld [vmem:[#allocation7 + $0x110] sm:$0xff]  ;;  %v488_v63 = vld [vmem:[#allocation7 + $0x1a8] sm:$0xff]  ;;  %v455_v5 = vld [vmem:[#allocation7 + $0xa0] sm:$0xff]  ;;  %v382_v40 = vsel %vm356_vm0, %v380_v21, %v381_v22 }
  0x65   : > { %557 = vmatpush.msra.mxu2 %v474_v41  ;;  %532 = vmatpush.msra.mxu1 %v460_v42  ;;  %v467_v6 = vld [vmem:[#allocation7 + $0x100] sm:$0xff]  ;;  %v454_v8 = vld [vmem:[#allocation7 + $0x98] sm:$0xff]  ;;  %v453_v10 = vld [vmem:[#allocation7 + $0x90] sm:$0xff]  ;;  %v357_v41 = vsel %vm356_vm0, %v354_v19, %v355_v20  ;;  %v335_v42 = vand.u32 15, %v323_v33 }
  0x66   : > { %512 = vmatpush.msra.mxu0 %v441_v43  ;;  %578 = vmatpush.msra.mxu3 %v492_v44  ;;  %v487_v7 = vld [vmem:[#allocation7 + $0x1a0] sm:$0xff]  ;;  %v486_v9 = vld [vmem:[#allocation7 + $0x198] sm:$0xff]  ;;  %v485_v11 = vld [vmem:[#allocation7 + $0x190] sm:$0xff]  ;;  %v368_v44 = vsel %vm367_vm3, %v365_v34, %v366_v35 }
  0x67   : > { %558 = vmatpush.msra.mxu2 %v473_v45  ;;  %533 = vmatpush.msra.mxu1 %v459_v46  ;;  %v452_v12 = vld [vmem:[#allocation7 + $0x88] sm:$0xff]  ;;  %v451_v14 = vld [vmem:[#allocation7 + $0x80] sm:$0xff]  ;;  %v388_v45 = vsel %vm367_vm3, %v386_v36, %v387_v37  ;;  %vm351_vm4 = vcmp.eq.s32.totalorder %v335_v42, 15 }
  0x68   : > { %513 = vmatpush.msra.mxu0 %v440_v47  ;;  %579 = vmatpush.msra.mxu3 %v491_v48  ;;  %v484_v13 = vld [vmem:[#allocation7 + $0x188] sm:$0xff]  ;;  %v483_v15 = vld [vmem:[#allocation7 + $0x180] sm:$0xff]  ;;  %v389_v47 = vsel %vm367_vm3, %v387_v37, %v386_v36 }
  0x69   : > { %559 = vmatpush.msra.mxu2 %v472_v49  ;;  %534 = vmatpush.msra.mxu1 %v458_v50  ;;  %v369_v50 = vsel %vm367_vm3, %v366_v35, %v365_v34 }
  0x6a   : > { %514 = vmatpush.msra.mxu0 %v439_v51  ;;  %580 = vmatpush.msra.mxu3 %v490_v52 }
  0x6b   : > { %560 = vmatpush.msra.mxu2 %v471_v53  ;;  %535 = vmatpush.msra.mxu1 %v457_v54  ;;  %v391_v53 = vsel %vm351_vm4, 0.0, %v389_v47  ;;  %v375_v54 = vsel %vm351_vm4, 0.0, %v369_v50  ;;  %vm735_vm4 = vcmask 31744  }
  0x6c   : > { %515 = vmatpush.msra.mxu0 %v438_v55  ;;  %581 = vmatpush.msra.mxu3 %v489_v56 }
  0x6d   : > { %561 = vmatpush.msra.mxu2 %v470_v57  ;;  %536 = vmatpush.msra.mxu1 %v456_v61  ;;  %v1663_v57 = vmov 15   ;;  %v1439_v61 = vld [vmem:[%s2160_s3] ss:$0 sm:$0xff] }
  0x6e   : > { %516 = vmatpush.msra.mxu0 %v437_v58  ;;  %582 = vmatpush.msra.mxu3 %v488_v63  ;;  %v1664_v58 = vmov 5  }
  0x6f   : > { %562 = vmatpush.msra.mxu2 %v469_v59  ;;  %537 = vmatpush.msra.mxu1 %v455_v5  ;;  %v1665_v59 = vmov 7  }
  0x70   : > { %517 = vmatpush.msra.mxu0 %v436_v60  ;;  %583 = vmatpush.msra.mxu3 %v487_v7 }
  0x71   : > { %563 = vmatpush.msra.mxu2 %v468_v62  ;;  %538 = vmatpush.msra.mxu1 %v454_v8 }
  0x72   : > { %518 = vmatpush.msra.mxu0 %v435_v3  ;;  %584 = vmatpush.msra.mxu3 %v486_v9 }
  0x73   : > { %564 = vmatpush.msra.mxu2 %v467_v6  ;;  %539 = vmatpush.msra.mxu1 %v453_v10 }
  0x74   : > { %585 = vmatpush.msra.mxu3 %v485_v11  ;;  %1426 = vset.pattern.permute.xlu2 %v1663_v57 }
  0x75   : > { %540 = vmatpush.msra.mxu1 %v452_v12  ;;  %1425 = vset.pattern.permute.xlu1 %v1664_v58 }
  0x76   : > { %586 = vmatpush.msra.mxu3 %v484_v13  ;;  %1424 = vset.pattern.permute.xlu0 %v1665_v59 }
  0x77   : > { %541 = vmatpush.msra.mxu1 %v451_v14 }
  0x78   : > { %587 = vmatpush.msra.mxu3 %v483_v15 }
  0xc7   : > { %v1406_v25 = vpop.permute.xlu0 %1405 }
  0xc8   : > { %v1408_v28 = vunpack.i.h.bf16 %v1406_v25  ;;  %v1407_v29 = vunpack.i.l.bf16 %v1406_v25  ;;  %v1416_v30 = vpop.permute.xlu1 %1415 }
  0xc9   : > { %v1418_v38 = vunpack.i.h.bf16 %v1416_v30  ;;  %v1417_v39 = vunpack.i.l.bf16 %v1416_v30 }
  0xca   : > { %v427_v31 = vsel %vm426_vm2, %v363_v26, %v1408_v28  ;;  %v431_v32 = vsel %vm426_vm2, %v384_v27, %v1407_v29 }
  0xcb   : > { %519 = vmatmul.f32.vlgmr.msra.gmra.mxu0 %v427_v31  ;;  %565 = vmatmul.f32.vlgmr.msra.gmra.mxu2 %v431_v32  ;;  %v432_v1 = vsel %vm426_vm2, %v382_v40, %v1417_v39  ;;  %v428_v4 = vsel %vm426_vm2, %v357_v41, %v1418_v38 }
  0xcf   : > { %v1411_v43 = vpop.permute.xlu0 %1410 }
  0xd0   : > { %v1413_v0 = vunpack.i.h.bf16 %v1411_v43  ;;  %v1412_v46 = vunpack.i.l.bf16 %v1411_v43  ;;  %v1421_v2 = vpop.permute.xlu1 %1420 }
  0xd1   : > { %v1423_v51 = vunpack.i.h.bf16 %v1421_v2  ;;  %v1422_v52 = vunpack.i.l.bf16 %v1421_v2 }
  0xd2   : > { %v429_v48 = vsel %vm426_vm2, %v368_v44, %v1413_v0  ;;  %v433_v49 = vsel %vm426_vm2, %v388_v45, %v1412_v46  ;;  %v1667_v46 = vmov 13  }
  0xd3   : > { %542 = vmatmul.f32.vlgmr.msra.gmra.mxu1 %v429_v48  ;;  %588 = vmatmul.f32.vlgmr.msra.gmra.mxu3 %v433_v49  ;;  %v434_v55 = vsel %vm426_vm2, %v391_v53, %v1422_v52  ;;  %v430_v56 = vsel %vm426_vm2, %v375_v54, %v1423_v51 }
  0xd4   : > { %568 = vmatmul.f32.gmra.mxu2 %v432_v1  ;;  %522 = vmatmul.f32.gmra.mxu0 %v428_v4 }
  0xdb   : > { %591 = vmatmul.f32.gmra.mxu3 %v434_v55  ;;  %545 = vmatmul.f32.gmra.mxu1 %v430_v56 }
 0x148   : > { %v520_v60 = vpop.f32.mrf.mxu0 }
 0x149   : > { %v521_v62 = vadd.f32 %v1439_v61, %v520_v60 }
 0x14e   : > { %v566_v63 = vpop.f32.mrf.mxu2 }
 0x150   : > { %v543_v3 = vpop.f32.mrf.mxu1 }
 0x151   : > { %v544_v5 = vadd.f32 %v543_v3, %v521_v62  ;;  %v523_v6 = vpop.f32.mrf.mxu0 }
 0x152   : > { %v524_v8 = vadd.f32 %v1439_v61, %v523_v6 }
 0x153   : > { %v567_v7 = vadd.f32 %v566_v63, %v544_v5 }
 0x156   : > { %v589_v9 = vpop.f32.mrf.mxu3 }
 0x157   : > { %v1921_v10 = vadd.f32 %v589_v9, %v567_v7  ;;  %v569_v12 = vpop.f32.mrf.mxu2 }
 0x158   : > { %v546_v11 = vpop.f32.mrf.mxu1 }
 0x159   : > { %v547_v13 = vadd.f32 %v546_v11, %v524_v8  ;;  %vm595_vm5 = vcmp.ge.f32.partialorder %v1921_v10, 0.0  ;;  %v597_v14 = vmul.f32 0.01, %v1921_v10  ;;  %v1294_v15 = vmul.f32 -1.442695, %v1921_v10 }
 0x15a   : > { %vm646_vm15 = vcmp.eq.f32.partialorder %v1921_v10, inf  ;;  %v649_v62 = vand.u32 2147483648, %v1921_v10  ;;  %vm648_vm0 = vcmp.eq.f32.partialorder %v1921_v10, 0.0 }
 0x15b   : > { %v570_v16 = vadd.f32 %v569_v12, %v547_v13  ;;  %v599_v17 = vsel %vm595_vm5, %v1921_v10, %v597_v14  ;;  %1440 = vpow2.f32 %v1294_v15  ;;  %vm857_vm5 = vcmask 64512  }
 0x15c   : > { %679 = vrot.lane.b32.xlu2 %v599_v17, %s1666_s26 }
 0x15e   : > { %v592_v18 = vpop.f32.mrf.mxu3 }
 0x15f   : > { %v1927_v19 = vadd.f32 %v592_v18, %v570_v16 }
 0x161   : > { %v1441_v20 = vpop.eup %1440  ;;  %vm596_vm6 = vcmp.ge.f32.partialorder %v1927_v19, 0.0  ;;  %v598_v21 = vmul.f32 0.01, %v1927_v19  ;;  %v1295_v22 = vmul.f32 -1.442695, %v1927_v19  ;;  %vm658_vm1 = vcmp.eq.f32.partialorder %v1927_v19, inf }
 0x162   : > { %v607_v23 = vadd.f32 1.0, %v1441_v20  ;;  %vm660_vm3 = vcmp.eq.f32.partialorder %v1927_v19, 0.0 }
 0x163   : > { %v600_v24 = vsel %vm596_vm6, %v1927_v19, %v598_v21  ;;  %1442 = vpow2.f32 %v1295_v22  ;;  %vm859_vm6 = vcmask 130048  }
 0x164   : > { %681 = vrot.lane.b32.xlu2 %v600_v24, %s1666_s26  ;;  %1444 = vrcp.f32 %v607_v23  ;;  %v620_v30 = vand.u32 2147483648, %v607_v23  ;;  %v618_v32 = vand.u32 2147483647, %v607_v23  ;;  %vm614_vm8 = vweird.f32 %v607_v23 }
 0x166   : > { %v621_v35 = vor.u32 1.1754944e-38, %v620_v30  ;;  %vm619_vm10 = vcmp.eq.f32.partialorder %v618_v32, 8.507059e+37 }
 0x169   : > { %v1443_v25 = vpop.eup %1442 }
 0x16a   : > { %v1445_v26 = vpop.eup %1444  ;;  %v608_v27 = vadd.f32 1.0, %v1443_v25 }
 0x16b   : > { %v610_v28 = vmul.f32 %v1445_v26, %v607_v23  ;;  %vm615_vm7 = vweird.f32 %v1445_v26 }
 0x16c   : > { %1446 = vrcp.f32 %v608_v27  ;;  %vm616_vm9 = vmor %vm614_vm8, %vm615_vm7  ;;  %v635_v39 = vand.u32 2147483648, %v608_v27  ;;  %vm629_vm11 = vweird.f32 %v608_v27  ;;  %v633_v41 = vand.u32 2147483647, %v608_v27 }
 0x16d   : > { %v611_v29 = vsub.f32 1.0, %v610_v28  ;;  %1448 = vrsqrt.f32 %v1921_v10  ;;  %vm861_vm7 = vcmask 195584   ;;  %vm863_vm8 = vcmask 261120  }
 0x16e   : > { %v636_v43 = vor.u32 1.1754944e-38, %v635_v39  ;;  %vm634_vm14 = vcmp.eq.f32.partialorder %v633_v41, 8.507059e+37  ;;  %1450 = vrsqrt.f32 %v1927_v19 }
 0x16f   : > { %v612_v31 = vmul.f32 %v1445_v26, %v611_v29 }
 0x171   : > { %v613_v33 = vadd.f32 %v1445_v26, %v612_v31 }
 0x172   : > { %v1447_v34 = vpop.eup %1446 }
 0x173   : > { %v617_v36 = vsel %vm616_vm9, %v1445_v26, %v613_v33  ;;  %v625_v37 = vmul.f32 %v1447_v34, %v608_v27  ;;  %vm630_vm12 = vweird.f32 %v1447_v34  ;;  %v1449_v50 = vpop.eup %1448  ;;  %v661_v26 = vand.u32 2147483648, %v1927_v19 }
 0x174   : > { %v622_v38 = vsel %vm619_vm10, %v621_v35, %v617_v36  ;;  %vm631_vm13 = vmor %vm629_vm11, %vm630_vm12  ;;  %v640_v51 = vmul.f32 %v1449_v50, %v1921_v10  ;;  %v1451_v5 = vpop.eup %1450  ;;  %vm865_vm9 = vcmask 326656   ;;  %vm867_vm10 = vcmask 392192  }
 0x175   : > { %700 = vperm.xlu1 %1425, %v622_v38   ;;  %665 = vperm.xlu0 %1424, %v622_v38   ;;  %v626_v40 = vsub.f32 1.0, %v625_v37  ;;  %v675_v2 = vsub.f32 1.0, %v622_v38  ;;  %v652_v9 = vmul.f32 %v1451_v5, %v1927_v19  ;;  %vm869_vm11 = vcmask 457728  }
 0x176   : > { %739 = vperm.xlu2 %1426, %v622_v38   ;;  %v641_v53 = vmul.f32 %v1449_v50, %v640_v51  ;;  %vm872_vm12 = vcmask 588800  }
 0x177   : > { %v627_v42 = vmul.f32 %v1447_v34, %v626_v40  ;;  %v653_v12 = vmul.f32 %v1451_v5, %v652_v9 }
 0x178   : > { %v642_v54 = vmul.f32 0.5, %v641_v53 }
 0x179   : > { %v628_v44 = vadd.f32 %v1447_v34, %v627_v42  ;;  %v654_v13 = vmul.f32 0.5, %v653_v12 }
 0x17a   : > { %v643_v56 = vsub.f32 1.5, %v642_v54 }
 0x17b   : > { %v632_v45 = vsel %vm631_vm13, %v1447_v34, %v628_v44  ;;  %v655_v14 = vsub.f32 1.5, %v654_v13  ;;  %vm874_vm13 = vcmask 654336  }
 0x17c   : > { %v637_v0 = vsel %vm634_vm14, %v636_v43, %v632_v45  ;;  %vm876_vm14 = vcmask 719872  }
 0x17d   : > { %1427 = vset.pattern.permute.xlu1 %v1667_v46  ;;  %1428 = vset.pattern.permute.xlu0 %v1663_v57  ;;  %v676_v47 = vsub.f32 1.0, %v637_v0  ;;  %v656_v17 = vmul.f32 %v1451_v5, %v655_v14 }
 0x17e   : > { %1429 = vset.pattern.permute.xlu2 %v1667_v46  ;;  %759 = vperm.xlu1 %1427, %v622_v38  }
 0x17f   : > { %743 = vperm.xlu0 %1428, %v637_v0   ;;  %763 = vperm.xlu2 %1429, %v637_v0   ;;  %v657_v18 = vmul.f32 %v656_v17, %v1927_v19 }
 0x181   : > { %v659_v27 = vsel %vm658_vm1, %v1927_v19, %v657_v18  ;;  %vm882_vm1 = vcmask 916480  }
 0x182   : > { %v662_v29 = vsel %vm660_vm3, %v661_v26, %v659_v27  ;;  %vm1091_vm3 = vcmask 1040384  }
 0x186   : > { %1431 = vset.pattern.permute.xlu1 %v1664_v58 }
 0x187   : > { %1430 = vset.pattern.permute.xlu2 %v1665_v59  ;;  %704 = vperm.xlu1 %1431, %v637_v0  }
 0x188   : > { %670 = vperm.xlu2 %1430, %v637_v0   ;;  %1433 = vset.pattern.permute.xlu0 %v1667_v46 }
 0x1b6   : > { %v680_v1 = vpop.permute.xlu2 %679 }
 0x1b7   : > { %v685_v4 = vmul.f32 %v680_v1, %v675_v2 }
 0x1b9   : > { %710 = vperm.xlu1 %1431, %v685_v4   ;;  %769 = vperm.xlu0 %1433, %v685_v4  }
 0x1ba   : > { %689 = vperm.xlu2 %1430, %v685_v4  }
 0x1be   : > { %v682_v48 = vpop.permute.xlu2 %681 }
 0x1bf   : > { %v686_v49 = vmul.f32 %v682_v48, %v676_v47 }
 0x1c1   : > { %1432 = vset.pattern.permute.xlu1 %v1663_v57  ;;  %1437 = vset.pattern.permute.xlu0 %v1664_v58 }
 0x1c2   : > { %1434 = vset.pattern.permute.xlu2 %v1663_v57  ;;  %749 = vperm.xlu1 %1432, %v685_v4   ;;  %v644_v57 = vmul.f32 %v1449_v50, %v643_v56 }
 0x1c3   : > { %714 = vperm.xlu0 %1437, %v686_v49   ;;  %753 = vperm.xlu2 %1434, %v686_v49  }
 0x1c4   : > { %v645_v58 = vmul.f32 %v644_v57, %v1921_v10 }
 0x1ca   : > { %1435 = vset.pattern.permute.xlu1 %v1667_v46 }
 0x1cb   : > { %1436 = vset.pattern.permute.xlu2 %v1665_v59  ;;  %773 = vperm.xlu1 %1435, %v686_v49   ;;  %v647_v59 = vsel %vm646_vm15, %v1921_v10, %v645_v58  ;;  %vm878_vm15 = vcmask 785408  }
 0x1cc   : > { %694 = vperm.xlu2 %1436, %v686_v49   ;;  %1438 = vset.pattern.permute.xlu0 %v1667_v46  ;;  %v650_v3 = vsel %vm648_vm0, %v649_v62, %v647_v59  ;;  %vm880_vm0 = vcmask 850944  }
 0x1d0   : > { %v740_v52 = vpop.permute.xlu2 %739 }
 0x1d1   : > { %v746_v31 = vmul.f32 %v740_v52, %v650_v3 }
 0x1d9   : > { %v764_v55 = vpop.permute.xlu2 %763 }
 0x1da   : > { %v767_v40 = vmul.f32 %v764_v55, %v662_v29 }
 0x1e2   : > { %v671_v60 = vpop.permute.xlu2 %670 }
 0x1e3   : > { %v674_v39 = vmul.f32 %v671_v60, %v662_v29 }
 0x1e7   : > { %v701_v61 = vpop.permute.xlu1 %700  ;;  %v666_v63 = vpop.permute.xlu0 %665 }
 0x1e8   : > { %v673_v6 = vmul.f32 %v666_v63, %v650_v3  ;;  %v707_v20 = vmul.f32 %v701_v61, %v650_v3 }
 0x1f0   : > { %v760_v11 = vpop.permute.xlu1 %759 }
 0x1f1   : > { %v744_v15 = vpop.permute.xlu0 %743  ;;  %v766_v21 = vmul.f32 %v760_v11, %v650_v3 }
 0x1f2   : > { %v747_v30 = vmul.f32 %v744_v15, %v662_v29 }
 0x1f9   : > { %v705_v16 = vpop.permute.xlu1 %704 }
 0x1fa   : > { %v708_v32 = vmul.f32 %v705_v16, %v662_v29 }
 0x214   : > { %v690_v7 = vpop.permute.xlu2 %689 }
 0x215   : > { %v697_v8 = vadd.f32 %v690_v7, %v673_v6 }
 0x217   : > { %721 = vrot.lane.b32.xlu1 %v697_v8, %s1668_s28 }
 0x21d   : > { %v754_v28 = vpop.permute.xlu2 %753 }
 0x21e   : > { %v757_v33 = vadd.f32 %v754_v28, %v747_v30 }
 0x226   : > { %v695_v38 = vpop.permute.xlu2 %694 }
 0x227   : > { %v698_v41 = vadd.f32 %v695_v38, %v674_v39 }
 0x22b   : > { %v711_v22 = vpop.permute.xlu1 %710  ;;  %v770_v23 = vpop.permute.xlu0 %769 }
 0x22c   : > { %v717_v24 = vadd.f32 %v711_v22, %v707_v20  ;;  %v776_v25 = vadd.f32 %v770_v23, %v766_v21 }
 0x22e   : > { %788 = vrot.lane.b32.xlu0 %v776_v25, %s1669_s6  ;;  %729 = vrot.lane.b32.xlu2 %v717_v24, %s1670_s7 }
 0x234   : > { %v750_v34 = vpop.permute.xlu1 %749 }
 0x235   : > { %v756_v35 = vadd.f32 %v750_v34, %v746_v31  ;;  %v715_v36 = vpop.permute.xlu0 %714 }
 0x236   : > { %v718_v37 = vadd.f32 %v715_v36, %v708_v32  ;;  %782 = vrot.lane.b32.xlu2 %v757_v33, %s1671_s15 }
 0x237   : > { %780 = vrot.lane.b32.xlu1 %v756_v35, %s1671_s15 }
 0x238   : > { %731 = vrot.lane.b32.xlu0 %v718_v37, %s1670_s7  ;;  %s317_s7 = scalar_lea.vmem [#allocation10], %s1845_s23  ;;  %s1598_s23 = scalar_lea.hbm %s2162_s5, 32 }
 0x23d   : > { %v774_v42 = vpop.permute.xlu1 %773 }
 0x23e   : > { %v777_v43 = vadd.f32 %v774_v42, %v767_v40  ;;  %723 = vrot.lane.b32.xlu2 %v698_v41, %s1668_s28 }
 0x240   : > { %790 = vrot.lane.b32.xlu1 %v777_v43, %s1669_s6 }
 0x288   : > { %v730_v44 = vpop.permute.xlu2 %729 }
 0x289   : > { %v722_v45 = vpop.permute.xlu1 %721 }
 0x28a   : > { %v1959_v0 = vsel %vm735_vm4, %v722_v45, %v730_v44 }
 0x28b   : > { %v801_v46 = vrot.slane %v1959_v0, 2  ;;  %v805_v47 = vrot.slane %v1959_v0, 3  ;;  %v809_v51 = vrot.slane %v1959_v0, 4  ;;  %v813_v52 = vrot.slane %v1959_v0, 5 }
 0x28c   : > { %v817_v53 = vrot.slane %v1959_v0, 6  ;;  %v821_v54 = vrot.slane %v1959_v0, 7  ;;  %v797_v3 = vrot.slane %v1959_v0, 1 }
 0x28d   : > { %802 = vrot.lane.b32.xlu2 %v801_v46, %s1672_s4 }
 0x290   : > { %v783_v48 = vpop.permute.xlu2 %782 }
 0x298   : > { %v724_v56 = vpop.permute.xlu2 %723 }
 0x2a0   : > { %v789_v2 = vpop.permute.xlu0 %788 }
 0x2a9   : > { %v781_v1 = vpop.permute.xlu1 %780 }
 0x2aa   : > { %v1964_v4 = vsel %vm735_vm4, %v781_v1, %v789_v2  ;;  %v732_v55 = vpop.permute.xlu0 %731 }
 0x2ab   : > { %966 = vrot.lane.b32.xlu0 %v1964_v4, %s1671_s15  ;;  %888 = vrot.lane.b32.xlu1 %v1964_v4, %s1673_s30  ;;  %v737_v57 = vsel %vm735_vm4, %v724_v56, %v732_v55 }
 0x2ac   : > { %v829_v58 = vrot.slane %v737_v57, 1  ;;  %v833_v60 = vrot.slane %v737_v57, 2  ;;  %v837_v59 = vrot.slane %v737_v57, 3  ;;  %v841_v61 = vrot.slane %v737_v57, 4 }
 0x2ad   : > { %v845_v62 = vrot.slane %v737_v57, 5  ;;  %v849_v5 = vrot.slane %v737_v57, 6  ;;  %v853_v7 = vrot.slane %v737_v57, 7 }
 0x2b2   : > { %v791_v49 = vpop.permute.xlu1 %790 }
 0x2b3   : > { %v1972_v50 = vsel %vm735_vm4, %v783_v48, %v791_v49  ;;  %894 = vrot.lane.b32.xlu1 %v1964_v4, %s1672_s4  ;;  %806 = vrot.lane.b32.xlu0 %v805_v47, %s1674_s8  ;;  %vm1093_vm4 = vcmask 1041408  }
 0x2b4   : > { %890 = vrot.lane.b32.xlu2 %v1972_v50, %s1673_s30 }
 0x2bb   : > { %900 = vrot.lane.b32.xlu1 %v1964_v4, %s1674_s8  ;;  %810 = vrot.lane.b32.xlu0 %v809_v51, %s1675_s16 }
 0x2bc   : > { %896 = vrot.lane.b32.xlu2 %v1972_v50, %s1672_s4 }
 0x2c3   : > { %906 = vrot.lane.b32.xlu1 %v1964_v4, %s1675_s16  ;;  %814 = vrot.lane.b32.xlu0 %v813_v52, %s1676_s2 }
 0x2c4   : > { %902 = vrot.lane.b32.xlu2 %v1972_v50, %s1674_s8 }
 0x2cb   : > { %912 = vrot.lane.b32.xlu1 %v1964_v4, %s1676_s2  ;;  %818 = vrot.lane.b32.xlu0 %v817_v53, %s1677_s0 }
 0x2cc   : > { %908 = vrot.lane.b32.xlu2 %v1972_v50, %s1675_s16 }
 0x2d3   : > { %918 = vrot.lane.b32.xlu1 %v1964_v4, %s1677_s0  ;;  %822 = vrot.lane.b32.xlu0 %v821_v54, %s1678_s9 }
 0x2d4   : > { %914 = vrot.lane.b32.xlu2 %v1972_v50, %s1676_s2 }
 0x2db   : > { %924 = vrot.lane.b32.xlu1 %v1964_v4, %s1678_s9  ;;  %826 = vrot.lane.b32.xlu0 %v737_v57, %s1662_s24 }
 0x2dc   : > { %920 = vrot.lane.b32.xlu2 %v1972_v50, %s1677_s0 }
 0x2e3   : > { %930 = vrot.lane.b32.xlu1 %v1964_v4, %s1662_s24  ;;  %830 = vrot.lane.b32.xlu0 %v829_v58, %s1679_s29 }
 0x2e4   : > { %926 = vrot.lane.b32.xlu2 %v1972_v50, %s1678_s9 }
 0x2e7   : > { %v2034_v63 = vpop.permute.xlu2 %802 }
 0x2eb   : > { %936 = vrot.lane.b32.xlu1 %v1964_v4, %s1679_s29  ;;  %834 = vrot.lane.b32.xlu0 %v833_v60, %s1680_s11 }
 0x2ec   : > { %932 = vrot.lane.b32.xlu2 %v1972_v50, %s1662_s24 }
 0x2f3   : > { %942 = vrot.lane.b32.xlu1 %v1964_v4, %s1680_s11  ;;  %838 = vrot.lane.b32.xlu0 %v837_v59, %s1681_s12 }
 0x2f4   : > { %938 = vrot.lane.b32.xlu2 %v1972_v50, %s1679_s29 }
 0x2fb   : > { %948 = vrot.lane.b32.xlu1 %v1964_v4, %s1681_s12  ;;  %842 = vrot.lane.b32.xlu0 %v841_v61, %s1682_s13 }
 0x2fc   : > { %944 = vrot.lane.b32.xlu2 %v1972_v50, %s1680_s11 }
 0x303   : > { %954 = vrot.lane.b32.xlu1 %v1964_v4, %s1682_s13  ;;  %846 = vrot.lane.b32.xlu0 %v845_v62, %s1683_s10 }
 0x304   : > { %950 = vrot.lane.b32.xlu2 %v1972_v50, %s1681_s12 }
 0x30b   : > { %798 = vrot.lane.b32.xlu1 %v797_v3, %s1673_s30  ;;  %850 = vrot.lane.b32.xlu0 %v849_v5, %s1671_s15 }
 0x30c   : > { %956 = vrot.lane.b32.xlu2 %v1972_v50, %s1682_s13 }
 0x30e   : > { %v891_v6 = vpop.permute.xlu2 %890 }
 0x30f   : > { %v979_v8 = vsel %vm857_vm5, %v1972_v50, %v891_v6 }
 0x313   : > { %960 = vrot.lane.b32.xlu1 %v1964_v4, %s1683_s10  ;;  %854 = vrot.lane.b32.xlu0 %v853_v7, %s1668_s28 }
 0x314   : > { %962 = vrot.lane.b32.xlu2 %v1972_v50, %s1683_s10 }
 0x316   : > { %v897_v9 = vpop.permute.xlu2 %896 }
 0x317   : > { %v981_v11 = vsel %vm859_vm6, %v979_v8, %v897_v9 }
 0x31b   : > { %968 = vrot.lane.b32.xlu1 %v1972_v50, %s1671_s15  ;;  %974 = vrot.lane.b32.xlu0 %v1972_v50, %s1668_s28 }
 0x31c   : > { %972 = vrot.lane.b32.xlu2 %v1964_v4, %s1668_s28 }
 0x31d   : > { %v2055_v12 = vpop.permute.xlu0 %966  ;;  %v889_v13 = vpop.permute.xlu1 %888 }
 0x31e   : > { %v903_v14 = vpop.permute.xlu2 %902  ;;  %v978_v16 = vsel %vm857_vm5, %v1964_v4, %v889_v13 }
 0x31f   : > { %v983_v15 = vsel %vm861_vm7, %v981_v11, %v903_v14 }
 0x325   : > { %v895_v17 = vpop.permute.xlu1 %894  ;;  %v807_v18 = vpop.permute.xlu0 %806 }
 0x326   : > { %v980_v20 = vsel %vm859_vm6, %v978_v16, %v895_v17  ;;  %v909_v21 = vpop.permute.xlu2 %908 }
 0x327   : > { %v985_v22 = vsel %vm863_vm8, %v983_v15, %v909_v21 }
 0x32d   : > { %v901_v23 = vpop.permute.xlu1 %900  ;;  %v811_v24 = vpop.permute.xlu0 %810 }
 0x32e   : > { %v982_v25 = vsel %vm861_vm7, %v980_v20, %v901_v23  ;;  %v915_v26 = vpop.permute.xlu2 %914 }
 0x32f   : > { %v987_v3 = vsel %vm865_vm9, %v985_v22, %v915_v26 }
 0x335   : > { %v907_v27 = vpop.permute.xlu1 %906  ;;  %v815_v28 = vpop.permute.xlu0 %814 }
 0x336   : > { %v984_v29 = vsel %vm863_vm8, %v982_v25, %v907_v27  ;;  %v921_v30 = vpop.permute.xlu2 %920 }
 0x337   : > { %v989_v9 = vsel %vm867_vm10, %v987_v3, %v921_v30 }
 0x33d   : > { %v913_v31 = vpop.permute.xlu1 %912  ;;  %v819_v32 = vpop.permute.xlu0 %818 }
 0x33e   : > { %v986_v33 = vsel %vm865_vm9, %v984_v29, %v913_v31  ;;  %v927_v36 = vpop.permute.xlu2 %926 }
 0x33f   : > { %v991_v14 = vsel %vm869_vm11, %v989_v9, %v927_v36 }
 0x345   : > { %v919_v34 = vpop.permute.xlu1 %918  ;;  %v823_v35 = vpop.permute.xlu0 %822 }
 0x346   : > { %v988_v37 = vsel %vm867_vm10, %v986_v33, %v919_v34  ;;  %v933_v40 = vpop.permute.xlu2 %932 }
 0x347   : > { %v993_v17 = vsel %vm426_vm2, %v991_v14, %v933_v40 }
 0x34d   : > { %v925_v38 = vpop.permute.xlu1 %924  ;;  %v827_v39 = vpop.permute.xlu0 %826 }
 0x34e   : > { %v939_v43 = vpop.permute.xlu2 %938  ;;  %v990_v58 = vsel %vm869_vm11, %v988_v37, %v925_v38 }
 0x34f   : > { %v995_v21 = vsel %vm872_vm12, %v993_v17, %v939_v43 }
 0x355   : > { %v931_v41 = vpop.permute.xlu1 %930  ;;  %v831_v42 = vpop.permute.xlu0 %830 }
 0x356   : > { %v945_v46 = vpop.permute.xlu2 %944  ;;  %v992_v61 = vsel %vm426_vm2, %v990_v58, %v931_v41 }
 0x357   : > { %v997_v23 = vsel %vm874_vm13, %v995_v21, %v945_v46 }
 0x35d   : > { %v937_v44 = vpop.permute.xlu1 %936  ;;  %v835_v45 = vpop.permute.xlu0 %834 }
 0x35e   : > { %v951_v48 = vpop.permute.xlu2 %950 }
 0x35f   : > { %v999_v25 = vsel %vm876_vm14, %v997_v23, %v951_v48 }
 0x365   : > { %v943_v2 = vpop.permute.xlu1 %942  ;;  %v839_v1 = vpop.permute.xlu0 %838 }
 0x366   : > { %v957_v51 = vpop.permute.xlu2 %956 }
 0x36d   : > { %v949_v4 = vpop.permute.xlu1 %948  ;;  %v843_v47 = vpop.permute.xlu0 %842 }
 0x36e   : > { %v963_v60 = vpop.permute.xlu2 %962 }
 0x375   : > { %v955_v49 = vpop.permute.xlu1 %954  ;;  %v847_v50 = vpop.permute.xlu0 %846 }
 0x376   : > { %v973_v29 = vpop.permute.xlu2 %972 }
 0x37d   : > { %v799_v52 = vpop.permute.xlu1 %798  ;;  %v851_v53 = vpop.permute.xlu0 %850 }
 0x37e   : > { %v858_v54 = vsel %vm857_vm5, %v1959_v0, %v799_v52  ;;  %v994_v0 = vsel %vm872_vm12, %v992_v61, %v937_v44 }
 0x37f   : > { %v860_v55 = vsel %vm859_vm6, %v858_v54, %v2034_v63  ;;  %v996_v5 = vsel %vm874_vm13, %v994_v0, %v943_v2  ;;  %vm1095_vm6 = vcmask 1042432  }
 0x380   : > { %v862_v56 = vsel %vm861_vm7, %v860_v55, %v807_v18  ;;  %v998_v11 = vsel %vm876_vm14, %v996_v5, %v949_v4  ;;  %vm1097_vm7 = vcmask 1043456  }
 0x381   : > { %v864_v57 = vsel %vm863_vm8, %v862_v56, %v811_v24  ;;  %v1000_v15 = vsel %vm878_vm15, %v998_v11, %v955_v49  ;;  %v1112_v11 = vld [vmem:[#allocation8] sm:$0xff]  ;;  %vm1101_vm8 = vcmask 1045504  }
 0x382   : > { %v866_v59 = vsel %vm865_vm9, %v864_v57, %v815_v28  ;;  %v1001_v28 = vsel %vm878_vm15, %v999_v25, %v957_v51  ;;  %1134 = vmatpush.msrb.mxu0 %v1112_v11  ;;  %1306 = vmatpush.msrb.mxu1 %v1112_v11  ;;  %vm1099_vm9 = vcmask 1044480  }
 0x383   : > { %v868_v62 = vsel %vm867_vm10, %v866_v59, %v819_v32  ;;  %v1003_v31 = vsel %vm880_vm0, %v1001_v28, %v963_v60  ;;  %vm1103_vm10 = vcmask 1046528  }
 0x384   : > { %v870_v63 = vsel %vm869_vm11, %v868_v62, %v823_v35 }
 0x385   : > { %v871_v6 = vsel %vm426_vm2, %v870_v63, %v827_v39  ;;  %v961_v7 = vpop.permute.xlu1 %960  ;;  %v855_v8 = vpop.permute.xlu0 %854  ;;  %vm884_vm2 = vcmask 982016  }
 0x386   : > { %v873_v13 = vsel %vm872_vm12, %v871_v6, %v831_v42  ;;  %v1002_v20 = vsel %vm880_vm0, %v1000_v15, %v961_v7 }
 0x387   : > { %v875_v16 = vsel %vm874_vm13, %v873_v13, %v835_v45  ;;  %v1004_v27 = vsel %vm882_vm1, %v1002_v20, %v2055_v12 }
 0x388   : > { %v877_v18 = vsel %vm876_vm14, %v875_v16, %v839_v1  ;;  %v1006_v35 = vsel %vm884_vm2, %v1004_v27, %v973_v29 }
 0x389   : > { %v879_v22 = vsel %vm878_vm15, %v877_v18, %v843_v47 }
 0x38a   : > { %v881_v24 = vsel %vm880_vm0, %v879_v22, %v847_v50 }
 0x38b   : > { %v883_v26 = vsel %vm882_vm1, %v881_v24, %v851_v53 }
 0x38c   : > { %v885_v30 = vsel %vm884_vm2, %v883_v26, %v855_v8 }
 0x38d   : > { %v1008_v32 = vperm.slane %v885_v30, 0  ;;  %v969_v33 = vpop.permute.xlu1 %968  ;;  %v975_v34 = vpop.permute.xlu0 %974 }
 0x38e   : > { %v1005_v36 = vsel %vm882_vm1, %v1003_v31, %v969_v33 }
 0x38f   : > { %v1009_v37 = vmul.f32 %v1008_v32, %v1006_v35  ;;  %v1007_v38 = vsel %vm884_vm2, %v1005_v36, %v975_v34 }
 0x390   : > { %v1010_v39 = vmul.f32 %v1008_v32, %v1007_v38 }
 0x392   : > { %v1011_v40 = vmax.f32 %v1009_v37, %v1010_v39 }
 0x394   : > { %v1012_v41 = vrot.slane %v1011_v40, 4 }
 0x396   : > { %v1013_v42 = vmax.f32 %v1011_v40, %v1012_v41 }
 0x398   : > { %v1014_v12 = vrot.slane %v1013_v42, 2 }
 0x39a   : > { %v1015_v43 = vmax.f32 %v1013_v42, %v1014_v12 }
 0x39c   : > { %v1016_v44 = vrot.slane %v1015_v43, 1 }
 0x39e   : > { %v1017_v45 = vmax.f32 %v1015_v43, %v1016_v44 }
 0x3a0   : > { %v1018_v46 = vsub.f32 %v1009_v37, %v1017_v45  ;;  %v1019_v2 = vsub.f32 %v1010_v39, %v1017_v45 }
 0x3a2   : > { %v1020_v1 = vmul.f32 1.442695, %v1018_v46  ;;  %v1022_v4 = vmul.f32 1.442695, %v1019_v2 }
 0x3a4   : > { %1452 = vpow2.f32 %v1020_v1 }
 0x3a5   : > { %1454 = vpow2.f32 %v1022_v4 }
 0x3aa   : > { %v1453_v47 = vpop.eup %1452 }
 0x3ab   : > { %v1455_v48 = vpop.eup %1454  ;;  %v1031_v49 = vmul.f32 %v1453_v47, %v1006_v35 }
 0x3ac   : > { %v1024_v50 = vadd.f32 %v1455_v48, %v1453_v47  ;;  %v1032_v51 = vmul.f32 %v1455_v48, %v1007_v38 }
 0x3ae   : > { %v1025_v52 = vrot.slane %v1024_v50, 4  ;;  %v1033_v53 = vadd.f32 %v1032_v51, %v1031_v49 }
 0x3b0   : > { %v1026_v54 = vadd.f32 %v1025_v52, %v1024_v50  ;;  %v1034_v55 = vrot.slane %v1033_v53, 4 }
 0x3b2   : > { %v1027_v56 = vrot.slane %v1026_v54, 2  ;;  %v1035_v58 = vadd.f32 %v1034_v55, %v1033_v53 }
 0x3b4   : > { %v1028_v57 = vadd.f32 %v1027_v56, %v1026_v54  ;;  %v1036_v61 = vrot.slane %v1035_v58, 2 }
 0x3b6   : > { %v1029_v60 = vrot.slane %v1028_v57, 1  ;;  %v1037_v62 = vadd.f32 %v1036_v61, %v1035_v58 }
 0x3b8   : > { %v1030_v59 = vadd.f32 %v1029_v60, %v1028_v57  ;;  %v1038_v63 = vrot.slane %v1037_v62, 1 }
 0x3ba   : > { %1456 = vrcp.f32 %v1030_v59  ;;  %v1039_v6 = vadd.f32 %v1038_v63, %v1037_v62 }
 0x3c0   : > { %v1457_v0 = vpop.eup %1456 }
 0x3c1   : > { %v1041_v3 = vmul.f32 %v1457_v0, %v1030_v59 }
 0x3c3   : > { %v1042_v5 = vsub.f32 2.0, %v1041_v3 }
 0x3c5   : > { %v1043_v7 = vmul.f32 %v1457_v0, %v1042_v5 }
 0x3c7   : > { %v1044_v8 = vmul.f32 %v1043_v7, %v1039_v6 }
 0x3c9   : > { %1070 = vrot.lane.b32.xlu0 %v1044_v8, %s1678_s9  ;;  %1067 = vrot.lane.b32.xlu2 %v1044_v8, %s1662_s24  ;;  %s1305_s24 = sshll.u32 %s1736_s22, 4 }
 0x3ca   : > { %1046 = vrot.lane.b32.xlu1 %v1044_v8, %s1668_s28  ;;  %s1158_s6 = scalar_lea.hbm %s2162_s5, %s1305_s24 }
 0x3d1   : > { %1052 = vrot.lane.b32.xlu0 %v1044_v8, %s1683_s10  ;;  %1073 = vrot.lane.b32.xlu2 %v1044_v8, %s1677_s0 }
 0x3d2   : > { %1049 = vrot.lane.b32.xlu1 %v1044_v8, %s1671_s15  ;;  %s1159_s15 = sshll.u32 %s317_s7, 4  ;;  %s1160_s15 = int_to_ptr.vmem [resolvable:$true] %s1159_s15 }
 0x3d9   : > { %1079 = vrot.lane.b32.xlu0 %v1044_v8, %s1675_s16  ;;  %1055 = vrot.lane.b32.xlu2 %v1044_v8, %s1682_s13 }
 0x3da   : > { %1076 = vrot.lane.b32.xlu1 %v1044_v8, %s1676_s2 }
 0x3e1   : > { %1061 = vrot.lane.b32.xlu0 %v1044_v8, %s1680_s11  ;;  %1082 = vrot.lane.b32.xlu2 %v1044_v8, %s1674_s8  ;;  %s1147_s8 = scalar_lea.sflag [#allocation4], %s1842_s27 }
 0x3e2   : > { %1058 = vrot.lane.b32.xlu1 %v1044_v8, %s1681_s12 }
 0x3e9   : > { %1088 = vrot.lane.b32.xlu0 %v1044_v8, %s1673_s30  ;;  %1064 = vrot.lane.b32.xlu2 %v1044_v8, %s1679_s29 }
 0x3ea   : > { %1085 = vrot.lane.b32.xlu1 %v1044_v8, %s1672_s4  ;;  %s1161_s4 = sshll.u32 %s1158_s6, 4  ;;  %s1162_s4 = int_to_ptr.hbm [resolvable:$true] %s1161_s4 }
 0x3eb   : > { %s1592_s22 = sshra.s32 %s1162_s4, 4  ;;  %s1593_s22 = int_to_ptr.hbm [resolvable:$true] %s1592_s22 }
 0x3ec   : > { %s1594_s16 = scalar_lea.hbm %s1593_s22, 16  ;;  %p1599_p2 = scmp.lt.s32.totalorder %s1593_s22, %s2162_s5 }
 0x3ed   : > { %p1595_p1 = scmp.ne.s32.totalorder %s1593_s22, %s1594_s16  ;;  %p1600_p10 = scmp.lt.s32.totalorder %s1598_s23, %s1594_s16 }
 0x3ef   : > { %p1596_p4 = pnand %p1595_p1, %p1784_p3  ;;  %p1601_p9 = por %p1600_p10, %p1599_p2 }
 0x3f1   : > { %p1597_p8 = pneg %p1596_p4 }
 0x3f3   : > { %p1602_p11 = pnand %p1601_p9, %p1597_p8 }
 0x423   : > { %v1068_v9 = vpop.permute.xlu2 %1067 }
 0x42b   : > { %v1074_v13 = vpop.permute.xlu2 %1073 }
 0x433   : > { %v1056_v16 = vpop.permute.xlu2 %1055 }
 0x43b   : > { %v1071_v14 = vpop.permute.xlu0 %1070  ;;  %v1083_v21 = vpop.permute.xlu2 %1082 }
 0x43c   : > { %v1047_v15 = vpop.permute.xlu1 %1046  ;;  %v1105_v26 = vsel %vm1091_vm3, %v1068_v9, %v1071_v14 }
 0x43d   : > { %v1092_v23 = vsel %vm1091_vm3, %v1044_v8, %v1047_v15  ;;  %v1106_v30 = vsel %vm1093_vm4, %v1105_v26, %v1074_v13 }
 0x443   : > { %v1053_v17 = vpop.permute.xlu0 %1052  ;;  %v1065_v32 = vpop.permute.xlu2 %1064 }
 0x444   : > { %v1050_v18 = vpop.permute.xlu1 %1049 }
 0x445   : > { %v1094_v24 = vsel %vm1093_vm4, %v1092_v23, %v1050_v18 }
 0x446   : > { %v1096_v25 = vsel %vm1095_vm6, %v1094_v24, %v1053_v17 }
 0x447   : > { %v1098_v28 = vsel %vm1097_vm7, %v1096_v25, %v1056_v16 }
 0x44b   : > { %v1080_v20 = vpop.permute.xlu0 %1079 }
 0x44c   : > { %v1077_v22 = vpop.permute.xlu1 %1076 }
 0x44d   : > { %v1107_v33 = vsel %vm1095_vm6, %v1106_v30, %v1077_v22 }
 0x44e   : > { %v1108_v36 = vsel %vm1097_vm7, %v1107_v33, %v1080_v20 }
 0x44f   : > { %v1109_v38 = vsel %vm1099_vm9, %v1108_v36, %v1083_v21 }
 0x453   : > { %v1062_v27 = vpop.permute.xlu0 %1061 }
 0x454   : > { %v1059_v29 = vpop.permute.xlu1 %1058 }
 0x455   : > { %v1100_v31 = vsel %vm1099_vm9, %v1098_v28, %v1059_v29 }
 0x456   : > { %v1102_v34 = vsel %vm1101_vm8, %v1100_v31, %v1062_v27 }
 0x457   : > { %v1104_v35 = vsel %vm1103_vm10, %v1102_v34, %v1065_v32 }
 0x458   : > { %1296 = vmatmul.msk.f32.vlgmr.msrb.gmra.mxu0 %vm857_vm5, %v1104_v35 }
 0x45b   : > { %v1089_v37 = vpop.permute.xlu0 %1088 }
 0x45c   : > { %v1086_v39 = vpop.permute.xlu1 %1085 }
 0x45d   : > { %v1110_v40 = vsel %vm1101_vm8, %v1109_v38, %v1086_v39 }
 0x45e   : > { %v1111_v41 = vsel %vm1103_vm10, %v1110_v40, %v1089_v37 }
 0x45f   : > { %1297 = vmatmul.msk.f32.vlgmr.msrb.gmra.mxu1 %vm857_vm5, %v1111_v41 }
 0x4d5   : > { %v1136_v42 = vpop.f32.mrf.mxu0 }
 0x4d6   : > { %v1142_v12 = vadd.f32 %v1136_v42, %v1921_v10 }
 0x4d8   : > { %1144 = vst [vmem:[%s317_s7] sm:$0xff] %v1142_v12 }
 0x4dc   : > { %v1139_v43 = vpop.f32.mrf.mxu1 }
 0x4dd   : > { %v1143_v44 = vadd.f32 %v1139_v43, %v1927_v19 }
 0x4df   : > { %1145 = vst [vmem:[%s317_s7 + $0x8] sm:$0xff] %v1143_v44 }
 0x4e0   : > { %1605 = shalt.err (!%p1602_p11)
}
 0x4e1   : > { %s1684_s27 = smov 128  }
 0x4e2   : > { %1319 = dma.vmem_to_hbm [thread:$0]  (%p1784_p3), %s1160_s15, 256, %s1162_s4, %s1147_s8, %s1684_s27, %s1684_s27, %s1673_s30  }
 0x4e3 PF: > { %s1176_s11 = sand.u32 1, %s1644_s18   ;;  %p2181_p12 = scmp.ge.s32.totalorder %s1656_s21, 2 }
 0x4e4   : > { %s1177_s12 = scalar_lea.sflag [#allocation4], %s1176_s11 }
 0x4e5   : > { %p1336_p13 = pnand %p2181_p12, %p1750_p6 }
 0x4e7   : > { %p1337_p0 = pneg %p1336_p13 }
 0x4e9   : > { %1639 = dma.done.wait (%p1337_p0), %s1177_s12, 256  }
 0x4ea   : > { %1641 = vsyncadd (%p1337_p0), %s1177_s12, 4294967040  ;;  %s2182_s13 = sld [smem:[#allocation16_spill]]  ;;  %p22_p5 = scmp.ge.s32.totalorder %s1774_s14, 4  }
 0x4eb   : > { %s2183_s18 = smov %s1648_s19  ;;  %s2184_s19 = smov %s1652_s20 }
 0x4ec   : > { %s2186_s21 = smov %s1774_s14  ;;  %24 = sbr.rel (!%p22_p5) target bundleno = 12 (0xc), region = 106 }
 0x4f0   : > { %s2185_s20 = smov %s2182_s13 }
 0x4f1   :  { %1183 = vsyncpa [#allocation3], 1 }
 0x4f2   :  { %1185 = vsyncpa [#allocation3 + $0x1], 1 }
 0x4f3   :  { %1186 = vsyncpa [#allocation6], 1 }
 0x4f4   :  { %1188 = vsyncpa [#allocation6 + $0x1], 1 }
 0x4f5   :  { %1189 = vsyncpa [#allocation9], 1 }
 0x4f6   :  { %1190 = vsyncpa [#allocation4], 1 }
 0x4f7   :  { %1192 = vsyncpa [#allocation4 + $0x1], 1 }

</bundles_post_ra>
